<compile_context>
chip_gen: v7x
topology: tpu7x:2x2x1
jax: 0.10.0
libtpu: 0.0.40
codegen_flags: <defaults>
</compile_context>

<pallas_src>
import jax
import jax.numpy as jnp
from jax.experimental import pallas as pl
from jax.experimental.pallas import tpu as pltpu

# KANLinear hyper-parameters (efficient-kan defaults)
GRID_SIZE = 5
SPLINE_ORDER = 3
GRID_RANGE = (-1.0, 1.0)
N_GRID = GRID_SIZE + 2 * SPLINE_ORDER + 1      # 12 grid points
N_COEF = GRID_SIZE + SPLINE_ORDER              # 8 B-spline bases per feature

DEFAULT_TILE_N = 256                           # rows (B*new_w) per grid step (lanes)


def _round_up(v, m):
    return -(-v // m) * m


# ---------------------------------------------------------------------------
# Pallas kernel: fused KANLinear, transposed / lane-dense layout.
#   grid_ref: (N_GRID,)              SMEM  uniform spline grid points
#   rden_ref: (SPLINE_ORDER*N_GRID,) SMEM  1/(grid[j+k]-grid[j]) reciprocals
#   x_ref:    (IN_PAD, TN)           VMEM  features on sublanes, rows on lanes
#   w_ref:    (OUT, (N_COEF+1)*IN_PAD) VMEM  [base_w | scaled_spline_w_j ...]
#   o_ref:    (OUT, TN)
# ---------------------------------------------------------------------------
def kan_linear_kernel(grid_ref, rden_ref, x_ref, w_ref, o_ref):
    x = x_ref[...]                                        # (IN_PAD, TN)

    def g(j):                                             # scalar grid point
        return grid_ref[j]

    def r(k, j):                                          # 1/(grid[j+k]-grid[j])
        return rden_ref[(k - 1) * N_GRID + j]

    # order-0 bases: indicator of x in [grid[j], grid[j+1])
    bases = [
        jnp.logical_and(x >= g(j), x < g(j + 1)).astype(x.dtype)
        for j in range(N_GRID - 1)
    ]
    # Cox-de Boor recursion; divisions replaced by precomputed reciprocals.
    for k in range(1, SPLINE_ORDER + 1):
        bases = [
            (x - g(j)) * r(k, j) * bases[j]
            + (g(j + k + 1) - x) * r(k, j + 1) * bases[j + 1]
            for j in range(len(bases) - 1)
        ]
    # bases: N_COEF arrays, each (IN_PAD, TN)

    base_act = x * jax.nn.sigmoid(x)                      # SiLU(x)  (EUP sigmoid)

    # One fused MXU matmul: (OUT, IN_CAT) @ (IN_CAT, TN) -> (OUT, TN).
    # All concat segments are IN_PAD (multiple of 8) rows -> aligned copies.
    a_cat = jnp.concatenate([base_act] + bases, axis=0)   # (IN_CAT, TN)
    o_ref[...] = jnp.dot(w_ref[...], a_cat,
                         preferred_element_type=jnp.float32).astype(o_ref.dtype)


def kan_linear_pallas(x2d_t, grid_1d, rden, w_cat, *, tile_n=DEFAULT_TILE_N):
    in_pad, n_pad = x2d_t.shape
    out_f, in_cat = w_cat.shape
    assert n_pad % tile_n == 0, "pad N to a multiple of tile_n in the wrapper"
    assert in_cat == (N_COEF + 1) * in_pad
    return pl.pallas_call(
        kan_linear_kernel,
        out_shape=jax.ShapeDtypeStruct((out_f, n_pad), jnp.float32),
        grid=(n_pad // tile_n,),
        in_specs=[
            pl.BlockSpec(memory_space=pltpu.MemorySpace.SMEM),   # grid_1d
            pl.BlockSpec(memory_space=pltpu.MemorySpace.SMEM),   # rden
            pl.BlockSpec((in_pad, tile_n), lambda i: (0, i)),    # x^T tile
            pl.BlockSpec((out_f, in_cat), lambda i: (0, 0)),     # W_cat (resident)
        ],
        out_specs=pl.BlockSpec((out_f, tile_n), lambda i: (0, i)),
        compiler_params=pltpu.CompilerParams(
            dimension_semantics=("parallel",)),
    )(grid_1d, rden, x2d_t, w_cat)


# ---------------------------------------------------------------------------
# KanConv1D wrapper (pad / unfold / transpose glue in plain JAX)
# ---------------------------------------------------------------------------
def kan_conv1d(x, params, *, kernel_size, stride, padding, tile_n=DEFAULT_TILE_N):
    B, C, W = x.shape
    xp = jnp.pad(x, ((0, 0), (0, 0), (padding, padding)))
    Wp = W + 2 * padding
    new_w = (Wp - kernel_size) // stride + 1
    # TODO(synk): fuse the im2col (overlapping-window unfold) into the Pallas
    # kernel (Element-offset BlockSpec / in-kernel pl.ds shifts) to avoid
    # materializing the K-times expanded patch array in HBM.
    idx = jnp.arange(new_w)[:, None] * stride + jnp.arange(kernel_size)[None, :]
    patches = xp[:, :, idx]                                   # (B, C, new_w, K)
    # transposed im2col: features (C*K) on sublanes, rows (B*new_w) on lanes
    x2d_t = jnp.transpose(patches, (1, 3, 0, 2)).reshape(
        C * kernel_size, B * new_w)

    n = B * new_w
    in_f = C * kernel_size
    in_pad = params["w_cat"].shape[1] // (N_COEF + 1)
    n_pad = _round_up(n, tile_n)
    x2d_t = jnp.pad(x2d_t, ((0, in_pad - in_f), (0, n_pad - n)))  # zeros: finite

    out_t = kan_linear_pallas(x2d_t, params["grid_1d"], params["rden"],
                              params["w_cat"], tile_n=tile_n)
    out_t = out_t[:, :n]                                      # (OUT, B*new_w)
    return jnp.transpose(out_t.reshape(-1, B, new_w), (1, 0, 2))  # (B, OUT, new_w)


# ---------------------------------------------------------------------------
# Deterministic parameter construction (shapes per KANLinear.__init__)
# ---------------------------------------------------------------------------
def make_params(key, in_features, out_features):
    k1, k2, k3 = jax.random.split(key, 3)
    h = (GRID_RANGE[1] - GRID_RANGE[0]) / GRID_SIZE
    grid_1d = (jnp.arange(-SPLINE_ORDER, GRID_SIZE + SPLINE_ORDER + 1,
                          dtype=jnp.float32) * h + GRID_RANGE[0])        # (N_GRID,)
    grid_full = jnp.broadcast_to(grid_1d, (in_features, N_GRID))          # (IN, N_GRID)

    base_w = 0.1 * jax.random.normal(k1, (out_features, in_features), jnp.float32)
    spline_w = 0.1 * jax.random.normal(
        k2, (out_features, in_features, N_COEF), jnp.float32)
    spline_scaler = 1.0 + 0.1 * jax.random.normal(
        k3, (out_features, in_features), jnp.float32)

    # --- kernel-friendly forms ---------------------------------------------
    in_pad = _round_up(in_features, 8)                  # sublane-aligned features
    scaled = spline_w * spline_scaler[:, :, None]       # (OUT, IN, N_COEF)

    def pad_in(w2):                                     # (OUT, IN) -> (OUT, IN_PAD)
        return jnp.pad(w2, ((0, 0), (0, in_pad - in_features)))

    # W_cat columns follow the in-kernel A_cat row order:
    #   [ silu(x) block | B_0(x) block | ... | B_{N_COEF-1}(x) block ]
    w_cat = jnp.concatenate(
        [pad_in(base_w)] + [pad_in(scaled[:, :, j]) for j in range(N_COEF)],
        axis=1)                                         # (OUT, (N_COEF+1)*IN_PAD)

    # reciprocal Cox-de Boor denominators: rden[(k-1)*N_GRID + j] = 1/(g[j+k]-g[j])
    rows = []
    for k in range(1, SPLINE_ORDER + 1):
        diff = grid_1d[k:] - grid_1d[:-k]               # (N_GRID - k,)
        rows.append(jnp.concatenate([1.0 / diff, jnp.zeros((k,), jnp.float32)]))
    rden = jnp.concatenate(rows).astype(jnp.float32)    # (SPLINE_ORDER*N_GRID,)

    return {
        # raw (reference) form
        "grid_full": grid_full,
        "base_w": base_w,
        "spline_w": spline_w,
        "spline_scaler": spline_scaler,
        # kernel-friendly form
        "grid_1d": grid_1d,
        "rden": rden,
        "w_cat": w_cat,
    }


# ---------------------------------------------------------------------------
# Pure-JAX reference (mirrors efficient-kan KANLinear exactly)
# ---------------------------------------------------------------------------
def kan_linear_ref(x2d, grid_full, base_w, spline_w, spline_scaler):
    xe = x2d[:, :, None]                       # (N, IN, 1)
    g = grid_full[None, :, :]                  # (1, IN, N_GRID)
    bases = jnp.logical_and(xe >= g[:, :, :-1], xe < g[:, :, 1:]).astype(x2d.dtype)
    for k in range(1, SPLINE_ORDER + 1):
        bases = (
            (xe - g[:, :, : -(k + 1)]) / (g[:, :, k:-1] - g[:, :, : -(k + 1)])
            * bases[:, :, :-1]
            + (g[:, :, k + 1:] - xe) / (g[:, :, k + 1:] - g[:, :, 1:-k])
            * bases[:, :, 1:]
        )
    base_out = jax.nn.silu(x2d) @ base_w.T
    scaled = spline_w * spline_scaler[:, :, None]
    spline_out = bases.reshape(x2d.shape[0], -1) @ scaled.reshape(scaled.shape[0], -1).T
    return base_out + spline_out


def kan_conv1d_ref(x, params, *, kernel_size, stride, padding):
    B, C, W = x.shape
    xp = jnp.pad(x, ((0, 0), (0, 0), (padding, padding)))
    new_w = (W + 2 * padding - kernel_size) // stride + 1
    idx = jnp.arange(new_w)[:, None] * stride + jnp.arange(kernel_size)[None, :]
    patches = jnp.transpose(xp[:, :, idx], (0, 2, 1, 3)).reshape(B * new_w, -1)
    out2d = kan_linear_ref(patches, params["grid_full"], params["base_w"],
                           params["spline_w"], params["spline_scaler"])
    return jnp.transpose(out2d.reshape(B, new_w, -1), (0, 2, 1))


if __name__ == "__main__":
    B, C_IN, W = 2, 4, 16
    C_OUT, K, STRIDE, PAD = 8, 3, 1, 1
    IN_FEATURES = C_IN * K

    key = jax.random.PRNGKey(0)
    kx, kp = jax.random.split(key)
    x = jax.random.normal(kx, (B, C_IN, W), jnp.float32)
    params = make_params(kp, IN_FEATURES, C_OUT)

    @jax.jit
    def fwd(x, params):
        return kan_conv1d(x, params, kernel_size=K, stride=STRIDE, padding=PAD)

    out = jax.block_until_ready(fwd(x, params))

    ref = kan_conv1d_ref(x, params, kernel_size=K, stride=STRIDE, padding=PAD)
    new_w = (W + 2 * PAD - K) // STRIDE + 1
    assert out.shape == (B, C_OUT, new_w), out.shape
    assert jnp.allclose(out, ref, atol=1e-5, rtol=1e-5), "mismatch vs reference"
    print("KERNEL_OK")
</pallas_src>

<mosaic_0001>
module attributes {stable_mosaic.version = 11 : i64} {
  func.func @kan_linear_kernel(%arg0: i32, %arg1: memref<12xf32, #tpu.memory_space<smem>>, %arg2: memref<36xf32, #tpu.memory_space<smem>>, %arg3: memref<16x256xf32, #tpu.memory_space<vmem>>, %arg4: memref<8x144xf32, #tpu.memory_space<vmem>>, %arg5: memref<8x256xf32, #tpu.memory_space<vmem>>) attributes {dimension_semantics = [#tpu.dimension_semantics<parallel>], iteration_bounds = array<i64: 1>, scalar_prefetch = 0 : i64, scratch_operands = 0 : i64, tpu.core_type = #tpu.core_type<tc>, window_params = [{transform_indices = @transform_0, window_bounds = array<i64: 12>}, {transform_indices = @transform_1, window_bounds = array<i64: 36>}, {transform_indices = @transform_2, window_bounds = array<i64: 16, 256>}, {pipeline_mode = #tpu.pipeline_mode<synchronous>, transform_indices = @transform_3, window_bounds = array<i64: 8, 144>}, {transform_indices = @transform_4, window_bounds = array<i64: 8, 256>}]} {
    %c0 = arith.constant 0 : index
    %c0_0 = arith.constant 0 : index
    %0 = vector.load %arg3[%c0, %c0_0] : memref<16x256xf32, #tpu.memory_space<vmem>>, vector<16x256xf32>
    %c0_1 = arith.constant 0 : index
    %1 = memref.load %arg1[%c0_1] : memref<12xf32, #tpu.memory_space<smem>>
    %2 = vector.broadcast %1 : f32 to vector<16x256xf32>
    %3 = arith.cmpf oge, %0, %2 : vector<16x256xf32>
    %c1 = arith.constant 1 : index
    %4 = memref.load %arg1[%c1] : memref<12xf32, #tpu.memory_space<smem>>
    %5 = vector.broadcast %4 : f32 to vector<16x256xf32>
    %6 = arith.cmpf olt, %0, %5 : vector<16x256xf32>
    %7 = arith.andi %3, %6 : vector<16x256xi1>
    %8 = arith.extui %7 : vector<16x256xi1> to vector<16x256xi32>
    %9 = arith.sitofp %8 : vector<16x256xi32> to vector<16x256xf32>
    %c1_2 = arith.constant 1 : index
    %10 = memref.load %arg1[%c1_2] : memref<12xf32, #tpu.memory_space<smem>>
    %11 = vector.broadcast %10 : f32 to vector<16x256xf32>
    %12 = arith.cmpf oge, %0, %11 : vector<16x256xf32>
    %c2 = arith.constant 2 : index
    %13 = memref.load %arg1[%c2] : memref<12xf32, #tpu.memory_space<smem>>
    %14 = vector.broadcast %13 : f32 to vector<16x256xf32>
    %15 = arith.cmpf olt, %0, %14 : vector<16x256xf32>
    %16 = arith.andi %12, %15 : vector<16x256xi1>
    %17 = arith.extui %16 : vector<16x256xi1> to vector<16x256xi32>
    %18 = arith.sitofp %17 : vector<16x256xi32> to vector<16x256xf32>
    %c2_3 = arith.constant 2 : index
    %19 = memref.load %arg1[%c2_3] : memref<12xf32, #tpu.memory_space<smem>>
    %20 = vector.broadcast %19 : f32 to vector<16x256xf32>
    %21 = arith.cmpf oge, %0, %20 : vector<16x256xf32>
    %c3 = arith.constant 3 : index
    %22 = memref.load %arg1[%c3] : memref<12xf32, #tpu.memory_space<smem>>
    %23 = vector.broadcast %22 : f32 to vector<16x256xf32>
    %24 = arith.cmpf olt, %0, %23 : vector<16x256xf32>
    %25 = arith.andi %21, %24 : vector<16x256xi1>
    %26 = arith.extui %25 : vector<16x256xi1> to vector<16x256xi32>
    %27 = arith.sitofp %26 : vector<16x256xi32> to vector<16x256xf32>
    %c3_4 = arith.constant 3 : index
    %28 = memref.load %arg1[%c3_4] : memref<12xf32, #tpu.memory_space<smem>>
    %29 = vector.broadcast %28 : f32 to vector<16x256xf32>
    %30 = arith.cmpf oge, %0, %29 : vector<16x256xf32>
    %c4 = arith.constant 4 : index
    %31 = memref.load %arg1[%c4] : memref<12xf32, #tpu.memory_space<smem>>
    %32 = vector.broadcast %31 : f32 to vector<16x256xf32>
    %33 = arith.cmpf olt, %0, %32 : vector<16x256xf32>
    %34 = arith.andi %30, %33 : vector<16x256xi1>
    %35 = arith.extui %34 : vector<16x256xi1> to vector<16x256xi32>
    %36 = arith.sitofp %35 : vector<16x256xi32> to vector<16x256xf32>
    %c4_5 = arith.constant 4 : index
    %37 = memref.load %arg1[%c4_5] : memref<12xf32, #tpu.memory_space<smem>>
    %38 = vector.broadcast %37 : f32 to vector<16x256xf32>
    %39 = arith.cmpf oge, %0, %38 : vector<16x256xf32>
    %c5 = arith.constant 5 : index
    %40 = memref.load %arg1[%c5] : memref<12xf32, #tpu.memory_space<smem>>
    %41 = vector.broadcast %40 : f32 to vector<16x256xf32>
    %42 = arith.cmpf olt, %0, %41 : vector<16x256xf32>
    %43 = arith.andi %39, %42 : vector<16x256xi1>
    %44 = arith.extui %43 : vector<16x256xi1> to vector<16x256xi32>
    %45 = arith.sitofp %44 : vector<16x256xi32> to vector<16x256xf32>
    %c5_6 = arith.constant 5 : index
    %46 = memref.load %arg1[%c5_6] : memref<12xf32, #tpu.memory_space<smem>>
    %47 = vector.broadcast %46 : f32 to vector<16x256xf32>
    %48 = arith.cmpf oge, %0, %47 : vector<16x256xf32>
    %c6 = arith.constant 6 : index
    %49 = memref.load %arg1[%c6] : memref<12xf32, #tpu.memory_space<smem>>
    %50 = vector.broadcast %49 : f32 to vector<16x256xf32>
    %51 = arith.cmpf olt, %0, %50 : vector<16x256xf32>
    %52 = arith.andi %48, %51 : vector<16x256xi1>
    %53 = arith.extui %52 : vector<16x256xi1> to vector<16x256xi32>
    %54 = arith.sitofp %53 : vector<16x256xi32> to vector<16x256xf32>
    %c6_7 = arith.constant 6 : index
    %55 = memref.load %arg1[%c6_7] : memref<12xf32, #tpu.memory_space<smem>>
    %56 = vector.broadcast %55 : f32 to vector<16x256xf32>
    %57 = arith.cmpf oge, %0, %56 : vector<16x256xf32>
    %c7 = arith.constant 7 : index
    %58 = memref.load %arg1[%c7] : memref<12xf32, #tpu.memory_space<smem>>
    %59 = vector.broadcast %58 : f32 to vector<16x256xf32>
    %60 = arith.cmpf olt, %0, %59 : vector<16x256xf32>
    %61 = arith.andi %57, %60 : vector<16x256xi1>
    %62 = arith.extui %61 : vector<16x256xi1> to vector<16x256xi32>
    %63 = arith.sitofp %62 : vector<16x256xi32> to vector<16x256xf32>
    %c7_8 = arith.constant 7 : index
    %64 = memref.load %arg1[%c7_8] : memref<12xf32, #tpu.memory_space<smem>>
    %65 = vector.broadcast %64 : f32 to vector<16x256xf32>
    %66 = arith.cmpf oge, %0, %65 : vector<16x256xf32>
    %c8 = arith.constant 8 : index
    %67 = memref.load %arg1[%c8] : memref<12xf32, #tpu.memory_space<smem>>
    %68 = vector.broadcast %67 : f32 to vector<16x256xf32>
    %69 = arith.cmpf olt, %0, %68 : vector<16x256xf32>
    %70 = arith.andi %66, %69 : vector<16x256xi1>
    %71 = arith.extui %70 : vector<16x256xi1> to vector<16x256xi32>
    %72 = arith.sitofp %71 : vector<16x256xi32> to vector<16x256xf32>
    %c8_9 = arith.constant 8 : index
    %73 = memref.load %arg1[%c8_9] : memref<12xf32, #tpu.memory_space<smem>>
    %74 = vector.broadcast %73 : f32 to vector<16x256xf32>
    %75 = arith.cmpf oge, %0, %74 : vector<16x256xf32>
    %c9 = arith.constant 9 : index
    %76 = memref.load %arg1[%c9] : memref<12xf32, #tpu.memory_space<smem>>
    %77 = vector.broadcast %76 : f32 to vector<16x256xf32>
    %78 = arith.cmpf olt, %0, %77 : vector<16x256xf32>
    %79 = arith.andi %75, %78 : vector<16x256xi1>
    %80 = arith.extui %79 : vector<16x256xi1> to vector<16x256xi32>
    %81 = arith.sitofp %80 : vector<16x256xi32> to vector<16x256xf32>
    %c9_10 = arith.constant 9 : index
    %82 = memref.load %arg1[%c9_10] : memref<12xf32, #tpu.memory_space<smem>>
    %83 = vector.broadcast %82 : f32 to vector<16x256xf32>
    %84 = arith.cmpf oge, %0, %83 : vector<16x256xf32>
    %c10 = arith.constant 10 : index
    %85 = memref.load %arg1[%c10] : memref<12xf32, #tpu.memory_space<smem>>
    %86 = vector.broadcast %85 : f32 to vector<16x256xf32>
    %87 = arith.cmpf olt, %0, %86 : vector<16x256xf32>
    %88 = arith.andi %84, %87 : vector<16x256xi1>
    %89 = arith.extui %88 : vector<16x256xi1> to vector<16x256xi32>
    %90 = arith.sitofp %89 : vector<16x256xi32> to vector<16x256xf32>
    %c10_11 = arith.constant 10 : index
    %91 = memref.load %arg1[%c10_11] : memref<12xf32, #tpu.memory_space<smem>>
    %92 = vector.broadcast %91 : f32 to vector<16x256xf32>
    %93 = arith.cmpf oge, %0, %92 : vector<16x256xf32>
    %c11 = arith.constant 11 : index
    %94 = memref.load %arg1[%c11] : memref<12xf32, #tpu.memory_space<smem>>
    %95 = vector.broadcast %94 : f32 to vector<16x256xf32>
    %96 = arith.cmpf olt, %0, %95 : vector<16x256xf32>
    %97 = arith.andi %93, %96 : vector<16x256xi1>
    %98 = arith.extui %97 : vector<16x256xi1> to vector<16x256xi32>
    %99 = arith.sitofp %98 : vector<16x256xi32> to vector<16x256xf32>
    %c0_12 = arith.constant 0 : index
    %100 = memref.load %arg1[%c0_12] : memref<12xf32, #tpu.memory_space<smem>>
    %101 = vector.broadcast %100 : f32 to vector<16x256xf32>
    %102 = arith.subf %0, %101 : vector<16x256xf32>
    %c0_13 = arith.constant 0 : index
    %103 = memref.load %arg2[%c0_13] : memref<36xf32, #tpu.memory_space<smem>>
    %104 = vector.broadcast %103 : f32 to vector<16x256xf32>
    %105 = arith.mulf %102, %104 : vector<16x256xf32>
    %106 = arith.mulf %105, %9 : vector<16x256xf32>
    %c2_14 = arith.constant 2 : index
    %107 = memref.load %arg1[%c2_14] : memref<12xf32, #tpu.memory_space<smem>>
    %108 = vector.broadcast %107 : f32 to vector<16x256xf32>
    %109 = arith.subf %108, %0 : vector<16x256xf32>
    %c1_15 = arith.constant 1 : index
    %110 = memref.load %arg2[%c1_15] : memref<36xf32, #tpu.memory_space<smem>>
    %111 = vector.broadcast %110 : f32 to vector<16x256xf32>
    %112 = arith.mulf %109, %111 : vector<16x256xf32>
    %113 = arith.mulf %112, %18 : vector<16x256xf32>
    %114 = arith.addf %106, %113 : vector<16x256xf32>
    %c1_16 = arith.constant 1 : index
    %115 = memref.load %arg1[%c1_16] : memref<12xf32, #tpu.memory_space<smem>>
    %116 = vector.broadcast %115 : f32 to vector<16x256xf32>
    %117 = arith.subf %0, %116 : vector<16x256xf32>
    %c1_17 = arith.constant 1 : index
    %118 = memref.load %arg2[%c1_17] : memref<36xf32, #tpu.memory_space<smem>>
    %119 = vector.broadcast %118 : f32 to vector<16x256xf32>
    %120 = arith.mulf %117, %119 : vector<16x256xf32>
    %121 = arith.mulf %120, %18 : vector<16x256xf32>
    %c3_18 = arith.constant 3 : index
    %122 = memref.load %arg1[%c3_18] : memref<12xf32, #tpu.memory_space<smem>>
    %123 = vector.broadcast %122 : f32 to vector<16x256xf32>
    %124 = arith.subf %123, %0 : vector<16x256xf32>
    %c2_19 = arith.constant 2 : index
    %125 = memref.load %arg2[%c2_19] : memref<36xf32, #tpu.memory_space<smem>>
    %126 = vector.broadcast %125 : f32 to vector<16x256xf32>
    %127 = arith.mulf %124, %126 : vector<16x256xf32>
    %128 = arith.mulf %127, %27 : vector<16x256xf32>
    %129 = arith.addf %121, %128 : vector<16x256xf32>
    %c2_20 = arith.constant 2 : index
    %130 = memref.load %arg1[%c2_20] : memref<12xf32, #tpu.memory_space<smem>>
    %131 = vector.broadcast %130 : f32 to vector<16x256xf32>
    %132 = arith.subf %0, %131 : vector<16x256xf32>
    %c2_21 = arith.constant 2 : index
    %133 = memref.load %arg2[%c2_21] : memref<36xf32, #tpu.memory_space<smem>>
    %134 = vector.broadcast %133 : f32 to vector<16x256xf32>
    %135 = arith.mulf %132, %134 : vector<16x256xf32>
    %136 = arith.mulf %135, %27 : vector<16x256xf32>
    %c4_22 = arith.constant 4 : index
    %137 = memref.load %arg1[%c4_22] : memref<12xf32, #tpu.memory_space<smem>>
    %138 = vector.broadcast %137 : f32 to vector<16x256xf32>
    %139 = arith.subf %138, %0 : vector<16x256xf32>
    %c3_23 = arith.constant 3 : index
    %140 = memref.load %arg2[%c3_23] : memref<36xf32, #tpu.memory_space<smem>>
    %141 = vector.broadcast %140 : f32 to vector<16x256xf32>
    %142 = arith.mulf %139, %141 : vector<16x256xf32>
    %143 = arith.mulf %142, %36 : vector<16x256xf32>
    %144 = arith.addf %136, %143 : vector<16x256xf32>
    %c3_24 = arith.constant 3 : index
    %145 = memref.load %arg1[%c3_24] : memref<12xf32, #tpu.memory_space<smem>>
    %146 = vector.broadcast %145 : f32 to vector<16x256xf32>
    %147 = arith.subf %0, %146 : vector<16x256xf32>
    %c3_25 = arith.constant 3 : index
    %148 = memref.load %arg2[%c3_25] : memref<36xf32, #tpu.memory_space<smem>>
    %149 = vector.broadcast %148 : f32 to vector<16x256xf32>
    %150 = arith.mulf %147, %149 : vector<16x256xf32>
    %151 = arith.mulf %150, %36 : vector<16x256xf32>
    %c5_26 = arith.constant 5 : index
    %152 = memref.load %arg1[%c5_26] : memref<12xf32, #tpu.memory_space<smem>>
    %153 = vector.broadcast %152 : f32 to vector<16x256xf32>
    %154 = arith.subf %153, %0 : vector<16x256xf32>
    %c4_27 = arith.constant 4 : index
    %155 = memref.load %arg2[%c4_27] : memref<36xf32, #tpu.memory_space<smem>>
    %156 = vector.broadcast %155 : f32 to vector<16x256xf32>
    %157 = arith.mulf %154, %156 : vector<16x256xf32>
    %158 = arith.mulf %157, %45 : vector<16x256xf32>
    %159 = arith.addf %151, %158 : vector<16x256xf32>
    %c4_28 = arith.constant 4 : index
    %160 = memref.load %arg1[%c4_28] : memref<12xf32, #tpu.memory_space<smem>>
    %161 = vector.broadcast %160 : f32 to vector<16x256xf32>
    %162 = arith.subf %0, %161 : vector<16x256xf32>
    %c4_29 = arith.constant 4 : index
    %163 = memref.load %arg2[%c4_29] : memref<36xf32, #tpu.memory_space<smem>>
    %164 = vector.broadcast %163 : f32 to vector<16x256xf32>
    %165 = arith.mulf %162, %164 : vector<16x256xf32>
    %166 = arith.mulf %165, %45 : vector<16x256xf32>
    %c6_30 = arith.constant 6 : index
    %167 = memref.load %arg1[%c6_30] : memref<12xf32, #tpu.memory_space<smem>>
    %168 = vector.broadcast %167 : f32 to vector<16x256xf32>
    %169 = arith.subf %168, %0 : vector<16x256xf32>
    %c5_31 = arith.constant 5 : index
    %170 = memref.load %arg2[%c5_31] : memref<36xf32, #tpu.memory_space<smem>>
    %171 = vector.broadcast %170 : f32 to vector<16x256xf32>
    %172 = arith.mulf %169, %171 : vector<16x256xf32>
    %173 = arith.mulf %172, %54 : vector<16x256xf32>
    %174 = arith.addf %166, %173 : vector<16x256xf32>
    %c5_32 = arith.constant 5 : index
    %175 = memref.load %arg1[%c5_32] : memref<12xf32, #tpu.memory_space<smem>>
    %176 = vector.broadcast %175 : f32 to vector<16x256xf32>
    %177 = arith.subf %0, %176 : vector<16x256xf32>
    %c5_33 = arith.constant 5 : index
    %178 = memref.load %arg2[%c5_33] : memref<36xf32, #tpu.memory_space<smem>>
    %179 = vector.broadcast %178 : f32 to vector<16x256xf32>
    %180 = arith.mulf %177, %179 : vector<16x256xf32>
    %181 = arith.mulf %180, %54 : vector<16x256xf32>
    %c7_34 = arith.constant 7 : index
    %182 = memref.load %arg1[%c7_34] : memref<12xf32, #tpu.memory_space<smem>>
    %183 = vector.broadcast %182 : f32 to vector<16x256xf32>
    %184 = arith.subf %183, %0 : vector<16x256xf32>
    %c6_35 = arith.constant 6 : index
    %185 = memref.load %arg2[%c6_35] : memref<36xf32, #tpu.memory_space<smem>>
    %186 = vector.broadcast %185 : f32 to vector<16x256xf32>
    %187 = arith.mulf %184, %186 : vector<16x256xf32>
    %188 = arith.mulf %187, %63 : vector<16x256xf32>
    %189 = arith.addf %181, %188 : vector<16x256xf32>
    %c6_36 = arith.constant 6 : index
    %190 = memref.load %arg1[%c6_36] : memref<12xf32, #tpu.memory_space<smem>>
    %191 = vector.broadcast %190 : f32 to vector<16x256xf32>
    %192 = arith.subf %0, %191 : vector<16x256xf32>
    %c6_37 = arith.constant 6 : index
    %193 = memref.load %arg2[%c6_37] : memref<36xf32, #tpu.memory_space<smem>>
    %194 = vector.broadcast %193 : f32 to vector<16x256xf32>
    %195 = arith.mulf %192, %194 : vector<16x256xf32>
    %196 = arith.mulf %195, %63 : vector<16x256xf32>
    %c8_38 = arith.constant 8 : index
    %197 = memref.load %arg1[%c8_38] : memref<12xf32, #tpu.memory_space<smem>>
    %198 = vector.broadcast %197 : f32 to vector<16x256xf32>
    %199 = arith.subf %198, %0 : vector<16x256xf32>
    %c7_39 = arith.constant 7 : index
    %200 = memref.load %arg2[%c7_39] : memref<36xf32, #tpu.memory_space<smem>>
    %201 = vector.broadcast %200 : f32 to vector<16x256xf32>
    %202 = arith.mulf %199, %201 : vector<16x256xf32>
    %203 = arith.mulf %202, %72 : vector<16x256xf32>
    %204 = arith.addf %196, %203 : vector<16x256xf32>
    %c7_40 = arith.constant 7 : index
    %205 = memref.load %arg1[%c7_40] : memref<12xf32, #tpu.memory_space<smem>>
    %206 = vector.broadcast %205 : f32 to vector<16x256xf32>
    %207 = arith.subf %0, %206 : vector<16x256xf32>
    %c7_41 = arith.constant 7 : index
    %208 = memref.load %arg2[%c7_41] : memref<36xf32, #tpu.memory_space<smem>>
    %209 = vector.broadcast %208 : f32 to vector<16x256xf32>
    %210 = arith.mulf %207, %209 : vector<16x256xf32>
    %211 = arith.mulf %210, %72 : vector<16x256xf32>
    %c9_42 = arith.constant 9 : index
    %212 = memref.load %arg1[%c9_42] : memref<12xf32, #tpu.memory_space<smem>>
    %213 = vector.broadcast %212 : f32 to vector<16x256xf32>
    %214 = arith.subf %213, %0 : vector<16x256xf32>
    %c8_43 = arith.constant 8 : index
    %215 = memref.load %arg2[%c8_43] : memref<36xf32, #tpu.memory_space<smem>>
    %216 = vector.broadcast %215 : f32 to vector<16x256xf32>
    %217 = arith.mulf %214, %216 : vector<16x256xf32>
    %218 = arith.mulf %217, %81 : vector<16x256xf32>
    %219 = arith.addf %211, %218 : vector<16x256xf32>
    %c8_44 = arith.constant 8 : index
    %220 = memref.load %arg1[%c8_44] : memref<12xf32, #tpu.memory_space<smem>>
    %221 = vector.broadcast %220 : f32 to vector<16x256xf32>
    %222 = arith.subf %0, %221 : vector<16x256xf32>
    %c8_45 = arith.constant 8 : index
    %223 = memref.load %arg2[%c8_45] : memref<36xf32, #tpu.memory_space<smem>>
    %224 = vector.broadcast %223 : f32 to vector<16x256xf32>
    %225 = arith.mulf %222, %224 : vector<16x256xf32>
    %226 = arith.mulf %225, %81 : vector<16x256xf32>
    %c10_46 = arith.constant 10 : index
    %227 = memref.load %arg1[%c10_46] : memref<12xf32, #tpu.memory_space<smem>>
    %228 = vector.broadcast %227 : f32 to vector<16x256xf32>
    %229 = arith.subf %228, %0 : vector<16x256xf32>
    %c9_47 = arith.constant 9 : index
    %230 = memref.load %arg2[%c9_47] : memref<36xf32, #tpu.memory_space<smem>>
    %231 = vector.broadcast %230 : f32 to vector<16x256xf32>
    %232 = arith.mulf %229, %231 : vector<16x256xf32>
    %233 = arith.mulf %232, %90 : vector<16x256xf32>
    %234 = arith.addf %226, %233 : vector<16x256xf32>
    %c9_48 = arith.constant 9 : index
    %235 = memref.load %arg1[%c9_48] : memref<12xf32, #tpu.memory_space<smem>>
    %236 = vector.broadcast %235 : f32 to vector<16x256xf32>
    %237 = arith.subf %0, %236 : vector<16x256xf32>
    %c9_49 = arith.constant 9 : index
    %238 = memref.load %arg2[%c9_49] : memref<36xf32, #tpu.memory_space<smem>>
    %239 = vector.broadcast %238 : f32 to vector<16x256xf32>
    %240 = arith.mulf %237, %239 : vector<16x256xf32>
    %241 = arith.mulf %240, %90 : vector<16x256xf32>
    %c11_50 = arith.constant 11 : index
    %242 = memref.load %arg1[%c11_50] : memref<12xf32, #tpu.memory_space<smem>>
    %243 = vector.broadcast %242 : f32 to vector<16x256xf32>
    %244 = arith.subf %243, %0 : vector<16x256xf32>
    %c10_51 = arith.constant 10 : index
    %245 = memref.load %arg2[%c10_51] : memref<36xf32, #tpu.memory_space<smem>>
    %246 = vector.broadcast %245 : f32 to vector<16x256xf32>
    %247 = arith.mulf %244, %246 : vector<16x256xf32>
    %248 = arith.mulf %247, %99 : vector<16x256xf32>
    %249 = arith.addf %241, %248 : vector<16x256xf32>
    %c0_52 = arith.constant 0 : index
    %250 = memref.load %arg1[%c0_52] : memref<12xf32, #tpu.memory_space<smem>>
    %251 = vector.broadcast %250 : f32 to vector<16x256xf32>
    %252 = arith.subf %0, %251 : vector<16x256xf32>
    %c12 = arith.constant 12 : index
    %253 = memref.load %arg2[%c12] : memref<36xf32, #tpu.memory_space<smem>>
    %254 = vector.broadcast %253 : f32 to vector<16x256xf32>
    %255 = arith.mulf %252, %254 : vector<16x256xf32>
    %256 = arith.mulf %255, %114 : vector<16x256xf32>
    %c3_53 = arith.constant 3 : index
    %257 = memref.load %arg1[%c3_53] : memref<12xf32, #tpu.memory_space<smem>>
    %258 = vector.broadcast %257 : f32 to vector<16x256xf32>
    %259 = arith.subf %258, %0 : vector<16x256xf32>
    %c13 = arith.constant 13 : index
    %260 = memref.load %arg2[%c13] : memref<36xf32, #tpu.memory_space<smem>>
    %261 = vector.broadcast %260 : f32 to vector<16x256xf32>
    %262 = arith.mulf %259, %261 : vector<16x256xf32>
    %263 = arith.mulf %262, %129 : vector<16x256xf32>
    %264 = arith.addf %256, %263 : vector<16x256xf32>
    %c1_54 = arith.constant 1 : index
    %265 = memref.load %arg1[%c1_54] : memref<12xf32, #tpu.memory_space<smem>>
    %266 = vector.broadcast %265 : f32 to vector<16x256xf32>
    %267 = arith.subf %0, %266 : vector<16x256xf32>
    %c13_55 = arith.constant 13 : index
    %268 = memref.load %arg2[%c13_55] : memref<36xf32, #tpu.memory_space<smem>>
    %269 = vector.broadcast %268 : f32 to vector<16x256xf32>
    %270 = arith.mulf %267, %269 : vector<16x256xf32>
    %271 = arith.mulf %270, %129 : vector<16x256xf32>
    %c4_56 = arith.constant 4 : index
    %272 = memref.load %arg1[%c4_56] : memref<12xf32, #tpu.memory_space<smem>>
    %273 = vector.broadcast %272 : f32 to vector<16x256xf32>
    %274 = arith.subf %273, %0 : vector<16x256xf32>
    %c14 = arith.constant 14 : index
    %275 = memref.load %arg2[%c14] : memref<36xf32, #tpu.memory_space<smem>>
    %276 = vector.broadcast %275 : f32 to vector<16x256xf32>
    %277 = arith.mulf %274, %276 : vector<16x256xf32>
    %278 = arith.mulf %277, %144 : vector<16x256xf32>
    %279 = arith.addf %271, %278 : vector<16x256xf32>
    %c2_57 = arith.constant 2 : index
    %280 = memref.load %arg1[%c2_57] : memref<12xf32, #tpu.memory_space<smem>>
    %281 = vector.broadcast %280 : f32 to vector<16x256xf32>
    %282 = arith.subf %0, %281 : vector<16x256xf32>
    %c14_58 = arith.constant 14 : index
    %283 = memref.load %arg2[%c14_58] : memref<36xf32, #tpu.memory_space<smem>>
    %284 = vector.broadcast %283 : f32 to vector<16x256xf32>
    %285 = arith.mulf %282, %284 : vector<16x256xf32>
    %286 = arith.mulf %285, %144 : vector<16x256xf32>
    %c5_59 = arith.constant 5 : index
    %287 = memref.load %arg1[%c5_59] : memref<12xf32, #tpu.memory_space<smem>>
    %288 = vector.broadcast %287 : f32 to vector<16x256xf32>
    %289 = arith.subf %288, %0 : vector<16x256xf32>
    %c15 = arith.constant 15 : index
    %290 = memref.load %arg2[%c15] : memref<36xf32, #tpu.memory_space<smem>>
    %291 = vector.broadcast %290 : f32 to vector<16x256xf32>
    %292 = arith.mulf %289, %291 : vector<16x256xf32>
    %293 = arith.mulf %292, %159 : vector<16x256xf32>
    %294 = arith.addf %286, %293 : vector<16x256xf32>
    %c3_60 = arith.constant 3 : index
    %295 = memref.load %arg1[%c3_60] : memref<12xf32, #tpu.memory_space<smem>>
    %296 = vector.broadcast %295 : f32 to vector<16x256xf32>
    %297 = arith.subf %0, %296 : vector<16x256xf32>
    %c15_61 = arith.constant 15 : index
    %298 = memref.load %arg2[%c15_61] : memref<36xf32, #tpu.memory_space<smem>>
    %299 = vector.broadcast %298 : f32 to vector<16x256xf32>
    %300 = arith.mulf %297, %299 : vector<16x256xf32>
    %301 = arith.mulf %300, %159 : vector<16x256xf32>
    %c6_62 = arith.constant 6 : index
    %302 = memref.load %arg1[%c6_62] : memref<12xf32, #tpu.memory_space<smem>>
    %303 = vector.broadcast %302 : f32 to vector<16x256xf32>
    %304 = arith.subf %303, %0 : vector<16x256xf32>
    %c16 = arith.constant 16 : index
    %305 = memref.load %arg2[%c16] : memref<36xf32, #tpu.memory_space<smem>>
    %306 = vector.broadcast %305 : f32 to vector<16x256xf32>
    %307 = arith.mulf %304, %306 : vector<16x256xf32>
    %308 = arith.mulf %307, %174 : vector<16x256xf32>
    %309 = arith.addf %301, %308 : vector<16x256xf32>
    %c4_63 = arith.constant 4 : index
    %310 = memref.load %arg1[%c4_63] : memref<12xf32, #tpu.memory_space<smem>>
    %311 = vector.broadcast %310 : f32 to vector<16x256xf32>
    %312 = arith.subf %0, %311 : vector<16x256xf32>
    %c16_64 = arith.constant 16 : index
    %313 = memref.load %arg2[%c16_64] : memref<36xf32, #tpu.memory_space<smem>>
    %314 = vector.broadcast %313 : f32 to vector<16x256xf32>
    %315 = arith.mulf %312, %314 : vector<16x256xf32>
    %316 = arith.mulf %315, %174 : vector<16x256xf32>
    %c7_65 = arith.constant 7 : index
    %317 = memref.load %arg1[%c7_65] : memref<12xf32, #tpu.memory_space<smem>>
    %318 = vector.broadcast %317 : f32 to vector<16x256xf32>
    %319 = arith.subf %318, %0 : vector<16x256xf32>
    %c17 = arith.constant 17 : index
    %320 = memref.load %arg2[%c17] : memref<36xf32, #tpu.memory_space<smem>>
    %321 = vector.broadcast %320 : f32 to vector<16x256xf32>
    %322 = arith.mulf %319, %321 : vector<16x256xf32>
    %323 = arith.mulf %322, %189 : vector<16x256xf32>
    %324 = arith.addf %316, %323 : vector<16x256xf32>
    %c5_66 = arith.constant 5 : index
    %325 = memref.load %arg1[%c5_66] : memref<12xf32, #tpu.memory_space<smem>>
    %326 = vector.broadcast %325 : f32 to vector<16x256xf32>
    %327 = arith.subf %0, %326 : vector<16x256xf32>
    %c17_67 = arith.constant 17 : index
    %328 = memref.load %arg2[%c17_67] : memref<36xf32, #tpu.memory_space<smem>>
    %329 = vector.broadcast %328 : f32 to vector<16x256xf32>
    %330 = arith.mulf %327, %329 : vector<16x256xf32>
    %331 = arith.mulf %330, %189 : vector<16x256xf32>
    %c8_68 = arith.constant 8 : index
    %332 = memref.load %arg1[%c8_68] : memref<12xf32, #tpu.memory_space<smem>>
    %333 = vector.broadcast %332 : f32 to vector<16x256xf32>
    %334 = arith.subf %333, %0 : vector<16x256xf32>
    %c18 = arith.constant 18 : index
    %335 = memref.load %arg2[%c18] : memref<36xf32, #tpu.memory_space<smem>>
    %336 = vector.broadcast %335 : f32 to vector<16x256xf32>
    %337 = arith.mulf %334, %336 : vector<16x256xf32>
    %338 = arith.mulf %337, %204 : vector<16x256xf32>
    %339 = arith.addf %331, %338 : vector<16x256xf32>
    %c6_69 = arith.constant 6 : index
    %340 = memref.load %arg1[%c6_69] : memref<12xf32, #tpu.memory_space<smem>>
    %341 = vector.broadcast %340 : f32 to vector<16x256xf32>
    %342 = arith.subf %0, %341 : vector<16x256xf32>
    %c18_70 = arith.constant 18 : index
    %343 = memref.load %arg2[%c18_70] : memref<36xf32, #tpu.memory_space<smem>>
    %344 = vector.broadcast %343 : f32 to vector<16x256xf32>
    %345 = arith.mulf %342, %344 : vector<16x256xf32>
    %346 = arith.mulf %345, %204 : vector<16x256xf32>
    %c9_71 = arith.constant 9 : index
    %347 = memref.load %arg1[%c9_71] : memref<12xf32, #tpu.memory_space<smem>>
    %348 = vector.broadcast %347 : f32 to vector<16x256xf32>
    %349 = arith.subf %348, %0 : vector<16x256xf32>
    %c19 = arith.constant 19 : index
    %350 = memref.load %arg2[%c19] : memref<36xf32, #tpu.memory_space<smem>>
    %351 = vector.broadcast %350 : f32 to vector<16x256xf32>
    %352 = arith.mulf %349, %351 : vector<16x256xf32>
    %353 = arith.mulf %352, %219 : vector<16x256xf32>
    %354 = arith.addf %346, %353 : vector<16x256xf32>
    %c7_72 = arith.constant 7 : index
    %355 = memref.load %arg1[%c7_72] : memref<12xf32, #tpu.memory_space<smem>>
    %356 = vector.broadcast %355 : f32 to vector<16x256xf32>
    %357 = arith.subf %0, %356 : vector<16x256xf32>
    %c19_73 = arith.constant 19 : index
    %358 = memref.load %arg2[%c19_73] : memref<36xf32, #tpu.memory_space<smem>>
    %359 = vector.broadcast %358 : f32 to vector<16x256xf32>
    %360 = arith.mulf %357, %359 : vector<16x256xf32>
    %361 = arith.mulf %360, %219 : vector<16x256xf32>
    %c10_74 = arith.constant 10 : index
    %362 = memref.load %arg1[%c10_74] : memref<12xf32, #tpu.memory_space<smem>>
    %363 = vector.broadcast %362 : f32 to vector<16x256xf32>
    %364 = arith.subf %363, %0 : vector<16x256xf32>
    %c20 = arith.constant 20 : index
    %365 = memref.load %arg2[%c20] : memref<36xf32, #tpu.memory_space<smem>>
    %366 = vector.broadcast %365 : f32 to vector<16x256xf32>
    %367 = arith.mulf %364, %366 : vector<16x256xf32>
    %368 = arith.mulf %367, %234 : vector<16x256xf32>
    %369 = arith.addf %361, %368 : vector<16x256xf32>
    %c8_75 = arith.constant 8 : index
    %370 = memref.load %arg1[%c8_75] : memref<12xf32, #tpu.memory_space<smem>>
    %371 = vector.broadcast %370 : f32 to vector<16x256xf32>
    %372 = arith.subf %0, %371 : vector<16x256xf32>
    %c20_76 = arith.constant 20 : index
    %373 = memref.load %arg2[%c20_76] : memref<36xf32, #tpu.memory_space<smem>>
    %374 = vector.broadcast %373 : f32 to vector<16x256xf32>
    %375 = arith.mulf %372, %374 : vector<16x256xf32>
    %376 = arith.mulf %375, %234 : vector<16x256xf32>
    %c11_77 = arith.constant 11 : index
    %377 = memref.load %arg1[%c11_77] : memref<12xf32, #tpu.memory_space<smem>>
    %378 = vector.broadcast %377 : f32 to vector<16x256xf32>
    %379 = arith.subf %378, %0 : vector<16x256xf32>
    %c21 = arith.constant 21 : index
    %380 = memref.load %arg2[%c21] : memref<36xf32, #tpu.memory_space<smem>>
    %381 = vector.broadcast %380 : f32 to vector<16x256xf32>
    %382 = arith.mulf %379, %381 : vector<16x256xf32>
    %383 = arith.mulf %382, %249 : vector<16x256xf32>
    %384 = arith.addf %376, %383 : vector<16x256xf32>
    %c0_78 = arith.constant 0 : index
    %385 = memref.load %arg1[%c0_78] : memref<12xf32, #tpu.memory_space<smem>>
    %386 = vector.broadcast %385 : f32 to vector<16x256xf32>
    %387 = arith.subf %0, %386 : vector<16x256xf32>
    %c24 = arith.constant 24 : index
    %388 = memref.load %arg2[%c24] : memref<36xf32, #tpu.memory_space<smem>>
    %389 = vector.broadcast %388 : f32 to vector<16x256xf32>
    %390 = arith.mulf %387, %389 : vector<16x256xf32>
    %391 = arith.mulf %390, %264 : vector<16x256xf32>
    %c4_79 = arith.constant 4 : index
    %392 = memref.load %arg1[%c4_79] : memref<12xf32, #tpu.memory_space<smem>>
    %393 = vector.broadcast %392 : f32 to vector<16x256xf32>
    %394 = arith.subf %393, %0 : vector<16x256xf32>
    %c25 = arith.constant 25 : index
    %395 = memref.load %arg2[%c25] : memref<36xf32, #tpu.memory_space<smem>>
    %396 = vector.broadcast %395 : f32 to vector<16x256xf32>
    %397 = arith.mulf %394, %396 : vector<16x256xf32>
    %398 = arith.mulf %397, %279 : vector<16x256xf32>
    %399 = arith.addf %391, %398 : vector<16x256xf32>
    %c1_80 = arith.constant 1 : index
    %400 = memref.load %arg1[%c1_80] : memref<12xf32, #tpu.memory_space<smem>>
    %401 = vector.broadcast %400 : f32 to vector<16x256xf32>
    %402 = arith.subf %0, %401 : vector<16x256xf32>
    %c25_81 = arith.constant 25 : index
    %403 = memref.load %arg2[%c25_81] : memref<36xf32, #tpu.memory_space<smem>>
    %404 = vector.broadcast %403 : f32 to vector<16x256xf32>
    %405 = arith.mulf %402, %404 : vector<16x256xf32>
    %406 = arith.mulf %405, %279 : vector<16x256xf32>
    %c5_82 = arith.constant 5 : index
    %407 = memref.load %arg1[%c5_82] : memref<12xf32, #tpu.memory_space<smem>>
    %408 = vector.broadcast %407 : f32 to vector<16x256xf32>
    %409 = arith.subf %408, %0 : vector<16x256xf32>
    %c26 = arith.constant 26 : index
    %410 = memref.load %arg2[%c26] : memref<36xf32, #tpu.memory_space<smem>>
    %411 = vector.broadcast %410 : f32 to vector<16x256xf32>
    %412 = arith.mulf %409, %411 : vector<16x256xf32>
    %413 = arith.mulf %412, %294 : vector<16x256xf32>
    %414 = arith.addf %406, %413 : vector<16x256xf32>
    %c2_83 = arith.constant 2 : index
    %415 = memref.load %arg1[%c2_83] : memref<12xf32, #tpu.memory_space<smem>>
    %416 = vector.broadcast %415 : f32 to vector<16x256xf32>
    %417 = arith.subf %0, %416 : vector<16x256xf32>
    %c26_84 = arith.constant 26 : index
    %418 = memref.load %arg2[%c26_84] : memref<36xf32, #tpu.memory_space<smem>>
    %419 = vector.broadcast %418 : f32 to vector<16x256xf32>
    %420 = arith.mulf %417, %419 : vector<16x256xf32>
    %421 = arith.mulf %420, %294 : vector<16x256xf32>
    %c6_85 = arith.constant 6 : index
    %422 = memref.load %arg1[%c6_85] : memref<12xf32, #tpu.memory_space<smem>>
    %423 = vector.broadcast %422 : f32 to vector<16x256xf32>
    %424 = arith.subf %423, %0 : vector<16x256xf32>
    %c27 = arith.constant 27 : index
    %425 = memref.load %arg2[%c27] : memref<36xf32, #tpu.memory_space<smem>>
    %426 = vector.broadcast %425 : f32 to vector<16x256xf32>
    %427 = arith.mulf %424, %426 : vector<16x256xf32>
    %428 = arith.mulf %427, %309 : vector<16x256xf32>
    %429 = arith.addf %421, %428 : vector<16x256xf32>
    %c3_86 = arith.constant 3 : index
    %430 = memref.load %arg1[%c3_86] : memref<12xf32, #tpu.memory_space<smem>>
    %431 = vector.broadcast %430 : f32 to vector<16x256xf32>
    %432 = arith.subf %0, %431 : vector<16x256xf32>
    %c27_87 = arith.constant 27 : index
    %433 = memref.load %arg2[%c27_87] : memref<36xf32, #tpu.memory_space<smem>>
    %434 = vector.broadcast %433 : f32 to vector<16x256xf32>
    %435 = arith.mulf %432, %434 : vector<16x256xf32>
    %436 = arith.mulf %435, %309 : vector<16x256xf32>
    %c7_88 = arith.constant 7 : index
    %437 = memref.load %arg1[%c7_88] : memref<12xf32, #tpu.memory_space<smem>>
    %438 = vector.broadcast %437 : f32 to vector<16x256xf32>
    %439 = arith.subf %438, %0 : vector<16x256xf32>
    %c28 = arith.constant 28 : index
    %440 = memref.load %arg2[%c28] : memref<36xf32, #tpu.memory_space<smem>>
    %441 = vector.broadcast %440 : f32 to vector<16x256xf32>
    %442 = arith.mulf %439, %441 : vector<16x256xf32>
    %443 = arith.mulf %442, %324 : vector<16x256xf32>
    %444 = arith.addf %436, %443 : vector<16x256xf32>
    %c4_89 = arith.constant 4 : index
    %445 = memref.load %arg1[%c4_89] : memref<12xf32, #tpu.memory_space<smem>>
    %446 = vector.broadcast %445 : f32 to vector<16x256xf32>
    %447 = arith.subf %0, %446 : vector<16x256xf32>
    %c28_90 = arith.constant 28 : index
    %448 = memref.load %arg2[%c28_90] : memref<36xf32, #tpu.memory_space<smem>>
    %449 = vector.broadcast %448 : f32 to vector<16x256xf32>
    %450 = arith.mulf %447, %449 : vector<16x256xf32>
    %451 = arith.mulf %450, %324 : vector<16x256xf32>
    %c8_91 = arith.constant 8 : index
    %452 = memref.load %arg1[%c8_91] : memref<12xf32, #tpu.memory_space<smem>>
    %453 = vector.broadcast %452 : f32 to vector<16x256xf32>
    %454 = arith.subf %453, %0 : vector<16x256xf32>
    %c29 = arith.constant 29 : index
    %455 = memref.load %arg2[%c29] : memref<36xf32, #tpu.memory_space<smem>>
    %456 = vector.broadcast %455 : f32 to vector<16x256xf32>
    %457 = arith.mulf %454, %456 : vector<16x256xf32>
    %458 = arith.mulf %457, %339 : vector<16x256xf32>
    %459 = arith.addf %451, %458 : vector<16x256xf32>
    %c5_92 = arith.constant 5 : index
    %460 = memref.load %arg1[%c5_92] : memref<12xf32, #tpu.memory_space<smem>>
    %461 = vector.broadcast %460 : f32 to vector<16x256xf32>
    %462 = arith.subf %0, %461 : vector<16x256xf32>
    %c29_93 = arith.constant 29 : index
    %463 = memref.load %arg2[%c29_93] : memref<36xf32, #tpu.memory_space<smem>>
    %464 = vector.broadcast %463 : f32 to vector<16x256xf32>
    %465 = arith.mulf %462, %464 : vector<16x256xf32>
    %466 = arith.mulf %465, %339 : vector<16x256xf32>
    %c9_94 = arith.constant 9 : index
    %467 = memref.load %arg1[%c9_94] : memref<12xf32, #tpu.memory_space<smem>>
    %468 = vector.broadcast %467 : f32 to vector<16x256xf32>
    %469 = arith.subf %468, %0 : vector<16x256xf32>
    %c30 = arith.constant 30 : index
    %470 = memref.load %arg2[%c30] : memref<36xf32, #tpu.memory_space<smem>>
    %471 = vector.broadcast %470 : f32 to vector<16x256xf32>
    %472 = arith.mulf %469, %471 : vector<16x256xf32>
    %473 = arith.mulf %472, %354 : vector<16x256xf32>
    %474 = arith.addf %466, %473 : vector<16x256xf32>
    %c6_95 = arith.constant 6 : index
    %475 = memref.load %arg1[%c6_95] : memref<12xf32, #tpu.memory_space<smem>>
    %476 = vector.broadcast %475 : f32 to vector<16x256xf32>
    %477 = arith.subf %0, %476 : vector<16x256xf32>
    %c30_96 = arith.constant 30 : index
    %478 = memref.load %arg2[%c30_96] : memref<36xf32, #tpu.memory_space<smem>>
    %479 = vector.broadcast %478 : f32 to vector<16x256xf32>
    %480 = arith.mulf %477, %479 : vector<16x256xf32>
    %481 = arith.mulf %480, %354 : vector<16x256xf32>
    %c10_97 = arith.constant 10 : index
    %482 = memref.load %arg1[%c10_97] : memref<12xf32, #tpu.memory_space<smem>>
    %483 = vector.broadcast %482 : f32 to vector<16x256xf32>
    %484 = arith.subf %483, %0 : vector<16x256xf32>
    %c31 = arith.constant 31 : index
    %485 = memref.load %arg2[%c31] : memref<36xf32, #tpu.memory_space<smem>>
    %486 = vector.broadcast %485 : f32 to vector<16x256xf32>
    %487 = arith.mulf %484, %486 : vector<16x256xf32>
    %488 = arith.mulf %487, %369 : vector<16x256xf32>
    %489 = arith.addf %481, %488 : vector<16x256xf32>
    %c7_98 = arith.constant 7 : index
    %490 = memref.load %arg1[%c7_98] : memref<12xf32, #tpu.memory_space<smem>>
    %491 = vector.broadcast %490 : f32 to vector<16x256xf32>
    %492 = arith.subf %0, %491 : vector<16x256xf32>
    %c31_99 = arith.constant 31 : index
    %493 = memref.load %arg2[%c31_99] : memref<36xf32, #tpu.memory_space<smem>>
    %494 = vector.broadcast %493 : f32 to vector<16x256xf32>
    %495 = arith.mulf %492, %494 : vector<16x256xf32>
    %496 = arith.mulf %495, %369 : vector<16x256xf32>
    %c11_100 = arith.constant 11 : index
    %497 = memref.load %arg1[%c11_100] : memref<12xf32, #tpu.memory_space<smem>>
    %498 = vector.broadcast %497 : f32 to vector<16x256xf32>
    %499 = arith.subf %498, %0 : vector<16x256xf32>
    %c32 = arith.constant 32 : index
    %500 = memref.load %arg2[%c32] : memref<36xf32, #tpu.memory_space<smem>>
    %501 = vector.broadcast %500 : f32 to vector<16x256xf32>
    %502 = arith.mulf %499, %501 : vector<16x256xf32>
    %503 = arith.mulf %502, %384 : vector<16x256xf32>
    %504 = arith.addf %496, %503 : vector<16x256xf32>
    %505 = arith.negf %0 : vector<16x256xf32>
    %506 = math.exp %505 : vector<16x256xf32>
    %cst = arith.constant 1.000000e+00 : f32
    %507 = vector.broadcast %cst : f32 to vector<16x256xf32>
    %508 = arith.addf %507, %506 : vector<16x256xf32>
    %509 = arith.divf %507, %508 : vector<16x256xf32>
    %510 = arith.mulf %0, %509 : vector<16x256xf32>
    %511 = tpu.concatenate %510, %399, %414, %429, %444, %459, %474, %489, %504 in 0 : vector<16x256xf32>, vector<16x256xf32>, vector<16x256xf32>, vector<16x256xf32>, vector<16x256xf32>, vector<16x256xf32>, vector<16x256xf32>, vector<16x256xf32>, vector<16x256xf32> -> vector<144x256xf32>
    %c0_101 = arith.constant 0 : index
    %c0_102 = arith.constant 0 : index
    %512 = vector.load %arg4[%c0_101, %c0_102] : memref<8x144xf32, #tpu.memory_space<vmem>>, vector<8x144xf32>
    %cst_103 = arith.constant dense<0.000000e+00> : vector<8x256xf32>
    %513 = tpu.matmul %512, %511, %cst_103 {dimension_numbers = #tpu.dot_dimension_numbers<[1], [0], [0], [1], [0, 0, 1, 1], [], []>} : vector<8x144xf32>, vector<144x256xf32>, vector<8x256xf32> -> vector<8x256xf32>
    %c0_104 = arith.constant 0 : index
    %c0_105 = arith.constant 0 : index
    %514 = vector.load %arg5[%c0_104, %c0_105] : memref<8x256xf32, #tpu.memory_space<vmem>>, vector<8x256xf32>
    tpu.vector_store %arg5[%c0_104, %c0_105], %513 {strides = array<i32>} : memref<8x256xf32, #tpu.memory_space<vmem>>, vector<8x256xf32>,
    return
  }
  func.func @transform_0(%arg0: i32) -> i32 {
    %c0_i32 = arith.constant 0 : i32
    %c0_i32_0 = arith.constant 0 : i32
    return %c0_i32 : i32
  }
  func.func @transform_1(%arg0: i32) -> i32 {
    %c0_i32 = arith.constant 0 : i32
    %c0_i32_0 = arith.constant 0 : i32
    return %c0_i32 : i32
  }
  func.func @transform_2(%arg0: i32) -> (i32, i32) {
    %c0_i32 = arith.constant 0 : i32
    %c0_i32_0 = arith.constant 0 : i32
    return %c0_i32, %arg0 : i32, i32
  }
  func.func @transform_3(%arg0: i32) -> (i32, i32) {
    %c0_i32 = arith.constant 0 : i32
    %c0_i32_0 = arith.constant 0 : i32
    %c0_i32_1 = arith.constant 0 : i32
    return %c0_i32, %c0_i32_0 : i32, i32
  }
  func.func @transform_4(%arg0: i32) -> (i32, i32) {
    %c0_i32 = arith.constant 0 : i32
    %c0_i32_0 = arith.constant 0 : i32
    return %c0_i32, %arg0 : i32, i32
  }
}

</mosaic_0001>

<bundles_post_ra>
// kernel: fwd.1
= control target key start
LH: loop header
LB: loop body
LE: loop exit
PB: predicated region body
PF: predicated region fallthrough
CT: control target
= control target key end

     0   :  { %9 = vsyncpa [#allocation3], 0  ;;  %s2700_s0 = inlined_call_operand.vmem [shape: f32[12], index: 0, kind: input, shape index: {}]   ;;  %s2701_s1 = inlined_call_operand.vmem [shape: f32[36], index: 1, kind: input, shape index: {}]   ;;  %s2702_s2 = inlined_call_operand.vmem [shape: f32[16,256], index: 2, kind: input, shape index: {}]   ;;  %s2703_s3 = inlined_call_operand.vmem [shape: f32[8,144], index: 3, kind: input, shape index: {}]   ;;  %s2704_s4 = inlined_call_operand.vmem [shape: f32[8,256], index: 4, kind: output, shape index: {}]  }
   0x1   :  { %s17_s17 = sshll.u32 %s2700_s0, 4  ;;  %s18_s17 = int_to_ptr.vmem [resolvable:$true] %s17_s17 }
   0x2   :  { %10 = vsyncpa [#allocation5], 0  ;;  %s27_s20 = sshll.u32 %s2701_s1, 4  ;;  %s1231_s21 = scalar_lea.vmem %s18_s17, 16  ;;  %s28_s20 = int_to_ptr.vmem [resolvable:$true] %s27_s20 }
   0x3   :  { %p1232_p0 = scmp.ne.s32.totalorder %s18_s17, %s1231_s21  ;;  %p1236_p1 = scmp.lt.s32.totalorder %s18_s17, %s18_s17 }
   0x4   :  { %p1237_p2 = scmp.lt.s32.totalorder %s1231_s21, %s1231_s21 }
   0x6   :  { %p1238_p3 = por %p1237_p2, %p1236_p1 }
   0x8   :  { %p1239_p4 = pnand %p1238_p3, %p1232_p0 }
   0xa   :  { %1242 = shalt.err (!%p1239_p4)
}
   0xb   :  { %s1259_s22 = smov [#allocation2]   ;;  %s1243_s23 = scalar_lea.vmem %s28_s20, 16 }
   0xc   :  { %20 = dma.vmem_to_smem %s18_s17, 16, %s1259_s22, [#allocation3]  }
   0xd   :  { %p1244_p5 = scmp.ne.s32.totalorder %s28_s20, %s1243_s23  ;;  %p1248_p6 = scmp.lt.s32.totalorder %s28_s20, %s28_s20 }
   0xe   :  { %p1249_p7 = scmp.lt.s32.totalorder %s1243_s23, %s1243_s23 }
  0x10   :  { %p1250_p8 = por %p1249_p7, %p1248_p6 }
  0x12   :  { %p1251_p9 = pnand %p1250_p8, %p1244_p5 }
  0x14   :  { %1254 = shalt.err (!%p1251_p9)
}
  0x15   :  { %s1260_s0 = smov [#allocation4]  }
  0x16   :  { %30 = dma.vmem_to_smem %s28_s20, 16, %s1260_s0, [#allocation5]  }
  0x17   :  { %1255 = dma.done.wait [#allocation3], 16  }
  0x18   :  { %1256 = vsyncadd [#allocation3], 4294967280 }
  0x19   :  { %1257 = dma.done.wait [#allocation5], 16  }
  0x1a   :  { %1258 = vsyncadd [#allocation5], 4294967280 }
  0x1b   :  { %41 = sfence }
  0x1c   :  { %v1296_v0 = vld [vmem:[%s2702_s2 + $0x8] sm:$0xff]  ;;  %v1301_v1 = vld [vmem:[%s2702_s2 + $0x18] sm:$0xff]  ;;  %v1306_v2 = vld [vmem:[%s2702_s2] sm:$0xff]  ;;  %s46_s29 = sld [smem:[#allocation2]]  ;;  %s1083_s6 = sld [smem:[#allocation2 + $0x1]]  ;;  %v1261_v17 = vmov 0.0  }
  0x1d   :  { %v1168_v3 = vmul.f32 -1.442695, %v1296_v0  ;;  %v1170_v4 = vmul.f32 -1.442695, %v1301_v1  ;;  %v1313_v5 = vld [vmem:[%s2702_s2 + $0x10] sm:$0xff]  ;;  %s1088_s7 = sld [smem:[#allocation2 + $0x2]] }
  0x1e   :  { %v1167_v6 = vmul.f32 -1.442695, %v1306_v2  ;;  %v1169_v7 = vmul.f32 -1.442695, %v1313_v5  ;;  %s1093_s8 = sld [smem:[#allocation2 + $0x3]]  ;;  %s1098_s9 = sld [smem:[#allocation2 + $0x4]] }
  0x1f   :  { %1211 = vpow2.f32 %v1168_v3  ;;  %s294_s10 = sld [smem:[#allocation4]]  ;;  %s1353_s11 = sld [smem:[#allocation4 + $0x1]] }
  0x20   :  { %1213 = vpow2.f32 %v1170_v4  ;;  %s1375_s12 = sld [smem:[#allocation4 + $0x2]]  ;;  %s1422_s13 = sld [smem:[#allocation4 + $0x3]] }
  0x21   :  { %1215 = vpow2.f32 %v1167_v6  ;;  %s1432_s14 = sld [smem:[#allocation4 + $0xc]]  ;;  %s1451_s15 = sld [smem:[#allocation4 + $0xd]] }
  0x22   :  { %1217 = vpow2.f32 %v1169_v7  ;;  %v1317_v8 = vstv %s46_s29  ;;  %v1323_v9 = vstv %s1083_s6  ;;  %s1453_s16 = sld [smem:[#allocation4 + $0xe]]  ;;  %s1480_s17 = sld [smem:[#allocation4 + $0x18]] }
  0x23   :  { %vm49_vm0 = vcmp.ge.f32.partialorder %v1296_v0, %v1317_v8  ;;  %vm51_vm1 = vcmp.ge.f32.partialorder %v1301_v1, %v1317_v8  ;;  %v1327_v10 = vsub.f32 %v1296_v0, %v1317_v8  ;;  %v1331_v11 = vsub.f32 %v1301_v1, %v1317_v8  ;;  %s1490_s18 = sld [smem:[#allocation4 + $0x19]]  ;;  %s1641_s19 = sld [smem:[#allocation2 + $0x5]] }
  0x24   :  { %v1335_v12 = vsub.f32 %v1306_v2, %v1317_v8  ;;  %vm55_vm2 = vcmp.lt.f32.partialorder %v1296_v0, %v1323_v9  ;;  %vm57_vm3 = vcmp.lt.f32.partialorder %v1301_v1, %v1323_v9  ;;  %vm71_vm4 = vcmp.ge.f32.partialorder %v1296_v0, %v1323_v9  ;;  %s1655_s20 = sld [smem:[#allocation4 + $0x4]]  ;;  %s1667_s21 = sld [smem:[#allocation4 + $0xf]] }
  0x25   :  { %vm73_vm5 = vcmp.ge.f32.partialorder %v1301_v1, %v1323_v9  ;;  %vm59_vm6 = vmand %vm49_vm0, %vm55_vm2  ;;  %v1345_v13 = vstv %s1088_s7  ;;  %v1347_v14 = vstv %s1093_s8  ;;  %v1349_v15 = vstv %s1098_s9  ;;  %s1693_s22 = sld [smem:[#allocation4 + $0x1a]]  ;;  %s1784_s23 = sld [smem:[#allocation2 + $0x6]] }
  0x26   :  { %v1351_v16 = vstv %s294_s10  ;;  %vm61_vm7 = vmand %vm51_vm1, %vm57_vm3  ;;  %v1085_v18 = vsel %vm59_vm6, 1.0, %v1261_v17  ;;  %vm77_vm8 = vcmp.lt.f32.partialorder %v1296_v0, %v1345_v13  ;;  %vm79_vm9 = vcmp.lt.f32.partialorder %v1301_v1, %v1345_v13  ;;  %s1801_s0 = sld [smem:[#allocation4 + $0x5]]  ;;  %s1817_s1 = sld [smem:[#allocation4 + $0x10]] }
  0x27   :  { %vm93_vm10 = vcmp.ge.f32.partialorder %v1296_v0, %v1345_v13  ;;  %v1087_v19 = vsel %vm61_vm7, 1.0, %v1261_v17  ;;  %vm81_vm11 = vmand %vm71_vm4, %vm77_vm8  ;;  %vm95_vm12 = vcmp.ge.f32.partialorder %v1301_v1, %v1345_v13  ;;  %vm99_vm13 = vcmp.lt.f32.partialorder %v1296_v0, %v1347_v14  ;;  %s1844_s24 = sld [smem:[#allocation4 + $0x1b]]  ;;  %s1936_s25 = sld [smem:[#allocation2 + $0x7]] }
  0x28   :  { %vm101_vm14 = vcmp.lt.f32.partialorder %v1301_v1, %v1347_v14  ;;  %vm83_vm15 = vmand %vm73_vm5, %vm79_vm9  ;;  %v1090_v21 = vsel %vm81_vm11, 1.0, %v1261_v17  ;;  %vm115_vm0 = vcmp.ge.f32.partialorder %v1296_v0, %v1347_v14  ;;  %vm117_vm1 = vcmp.ge.f32.partialorder %v1301_v1, %v1347_v14  ;;  %s1938_s26 = sld [smem:[#allocation4 + $0x6]]  ;;  %s1968_s27 = sld [smem:[#allocation4 + $0x11]] }
  0x29   :  { %v1212_v20 = vpop.eup %1211  ;;  %vm121_vm2 = vcmp.lt.f32.partialorder %v1296_v0, %v1349_v15  ;;  %v1092_v24 = vsel %vm83_vm15, 1.0, %v1261_v17  ;;  %vm103_vm3 = vmand %vm93_vm10, %vm99_vm13  ;;  %vm123_vm4 = vcmp.lt.f32.partialorder %v1301_v1, %v1349_v15  ;;  %v297_v25 = vmul.f32 %v1351_v16, %v1327_v10  ;;  %s1997_s28 = sld [smem:[#allocation4 + $0x1c]]  ;;  %s2099_s7 = sld [smem:[#allocation2 + $0x8]] }
  0x2a   :  { %v1214_v22 = vpop.eup %1213  ;;  %v983_v23 = vadd.f32 1.0, %v1212_v20  ;;  %vm105_vm5 = vmand %vm95_vm12, %vm101_vm14  ;;  %v1095_v28 = vsel %vm103_vm3, 1.0, %v1261_v17  ;;  %v299_v29 = vmul.f32 %v1351_v16, %v1331_v11  ;;  %v305_v30 = vsub.f32 %v1345_v13, %v1296_v0  ;;  %s2116_s8 = sld [smem:[#allocation4 + $0x7]]  ;;  %s2132_s9 = sld [smem:[#allocation4 + $0x12]] }
  0x2b   :  { %v1216_v26 = vpop.eup %1215  ;;  %v985_v27 = vadd.f32 1.0, %v1214_v22  ;;  %v1097_v33 = vsel %vm105_vm5, 1.0, %v1261_v17  ;;  %vm125_vm6 = vmand %vm115_vm0, %vm121_vm2  ;;  %v301_v34 = vmul.f32 %v1085_v18, %v297_v25  ;;  %v307_v39 = vsub.f32 %v1345_v13, %v1301_v1 }
  0x2c   :  { %v1218_v31 = vpop.eup %1217  ;;  %1219 = vrcp.f32 %v983_v23  ;;  %v982_v32 = vadd.f32 1.0, %v1216_v26  ;;  %vm127_vm7 = vmand %vm117_vm1, %vm123_vm4  ;;  %v1420_v36 = vsel %vm125_vm6, 1.0, %v1261_v17  ;;  %v303_v37 = vmul.f32 %v1087_v19, %v299_v29 }
  0x2d   :  { %1221 = vrcp.f32 %v985_v27  ;;  %v984_v35 = vadd.f32 1.0, %v1218_v31  ;;  %v1425_v38 = vsel %vm127_vm7, 1.0, %v1261_v17  ;;  %v1430_v40 = vstv %s1353_s11 }
  0x2e   :  { %1223 = vrcp.f32 %v982_v32  ;;  %v311_v41 = vmul.f32 %v1430_v40, %v305_v30  ;;  %v1437_v42 = vsub.f32 %v1296_v0, %v1323_v9  ;;  %v1441_v43 = vsub.f32 %v1301_v1, %v1323_v9 }
  0x2f   :  { %1225 = vrcp.f32 %v984_v35  ;;  %v313_v44 = vmul.f32 %v1430_v40, %v307_v39  ;;  %v335_v45 = vsub.f32 %v1347_v14, %v1296_v0  ;;  %v337_v46 = vsub.f32 %v1347_v14, %v1301_v1 }
  0x30   :  { %v1449_v47 = vstv %s1375_s12  ;;  %v315_v48 = vmul.f32 %v1090_v21, %v311_v41  ;;  %v327_v49 = vmul.f32 %v1437_v42, %v1430_v40  ;;  %v329_v50 = vmul.f32 %v1441_v43, %v1430_v40 }
  0x31   :  { %v1461_v51 = vsub.f32 %v1296_v0, %v1345_v13  ;;  %v317_v52 = vmul.f32 %v1092_v24, %v313_v44  ;;  %v341_v53 = vmul.f32 %v1449_v47, %v335_v45  ;;  %v343_v54 = vmul.f32 %v1449_v47, %v337_v46 }
  0x32   :  { %v1467_v55 = vsub.f32 %v1301_v1, %v1345_v13  ;;  %v319_v56 = vadd.f32 %v315_v48, %v301_v34  ;;  %v331_v57 = vmul.f32 %v1090_v21, %v327_v49  ;;  %v333_v58 = vmul.f32 %v1092_v24, %v329_v50 }
  0x33   :  { %v357_v59 = vmul.f32 %v1461_v51, %v1449_v47  ;;  %v321_v60 = vadd.f32 %v317_v52, %v303_v37  ;;  %v345_v61 = vmul.f32 %v1095_v28, %v341_v53  ;;  %v347_v62 = vmul.f32 %v1097_v33, %v343_v54 }
  0x34   :  { %v359_v63 = vmul.f32 %v1467_v55, %v1449_v47  ;;  %v365_v4 = vsub.f32 %v1349_v15, %v1296_v0  ;;  %v367_v6 = vsub.f32 %v1349_v15, %v1301_v1  ;;  %v1478_v7 = vstv %s1422_s13 }
  0x35   :  { %v361_v3 = vmul.f32 %v1095_v28, %v357_v59  ;;  %v349_v19 = vadd.f32 %v345_v61, %v331_v57  ;;  %v351_v20 = vadd.f32 %v347_v62, %v333_v58  ;;  %v1483_v22 = vstv %s1432_s14  ;;  %s2261_s14 = sld [smem:[#allocation2 + $0x9]] }
  0x36   :  { %v1220_v18 = vpop.eup %1219  ;;  %v363_v21 = vmul.f32 %v1097_v33, %v359_v63  ;;  %v371_v25 = vmul.f32 %v1478_v7, %v365_v4  ;;  %v373_v26 = vmul.f32 %v1478_v7, %v367_v6  ;;  %v595_v27 = vmul.f32 %v1483_v22, %v1327_v10 }
  0x37   :  { %v1222_v23 = vpop.eup %1221  ;;  %v995_v24 = vmul.f32 %v1220_v18, %v1296_v0  ;;  %vm48_vm8 = vcmp.ge.f32.partialorder %v1306_v2, %v1317_v8  ;;  %v597_v30 = vmul.f32 %v1483_v22, %v1331_v11  ;;  %v1498_v31 = vstv %s1451_s15  ;;  %s2263_s15 = sld [smem:[#allocation4 + $0x8]] }
  0x38   :  { %v1224_v28 = vpop.eup %1223  ;;  %v997_v29 = vmul.f32 %v1222_v23, %v1301_v1  ;;  %v1501_v32 = vstv %s1453_s16  ;;  %vm50_vm9 = vcmp.ge.f32.partialorder %v1313_v5, %v1317_v8  ;;  %v375_v35 = vmul.f32 %v1420_v36, %v371_v25  ;;  %s2293_s16 = sld [smem:[#allocation4 + $0x13]] }
  0x39   :  { %v1226_v33 = vpop.eup %1225  ;;  %v994_v34 = vmul.f32 %v1224_v28, %v1306_v2  ;;  %v377_v37 = vmul.f32 %v1425_v38, %v373_v26  ;;  %v599_v39 = vmul.f32 %v595_v27, %v319_v56  ;;  %v601_v48 = vmul.f32 %v597_v30, %v321_v60 }
  0x3a   :  { %v1172_v41 = vpack.c.bf16 %v997_v29, %v995_v24  ;;  %v996_v44 = vmul.f32 %v1226_v33, %v1313_v5  ;;  %v605_v49 = vmul.f32 %v1498_v31, %v335_v45  ;;  %v1510_v50 = vadd.f32 %v375_v35, %v361_v3 }
  0x3b   :  { %v1512_v52 = vadd.f32 %v377_v37, %v363_v21  ;;  %v607_v53 = vmul.f32 %v1498_v31, %v337_v46  ;;  %v617_v54 = vmul.f32 %v1498_v31, %v1437_v42  ;;  %v619_v58 = vmul.f32 %v1498_v31, %v1441_v43 }
  0x3c   :  { %1173 = vmatprep.subr.bf16.mxu0 %v1172_v41  ;;  %v1174_v57 = vpack.c.bf16 %v996_v44, %v994_v34  ;;  %v609_v56 = vmul.f32 %v605_v49, %v349_v19  ;;  %v627_v59 = vmul.f32 %v1501_v32, %v365_v4  ;;  %v629_v61 = vmul.f32 %v1501_v32, %v367_v6 }
  0x3d   :  { %v611_v60 = vmul.f32 %v607_v53, %v351_v20  ;;  %v621_v45 = vmul.f32 %v617_v54, %v349_v19  ;;  %v1522_v62 = vstv %s1480_s17  ;;  %v623_v63 = vmul.f32 %v619_v58, %v351_v20  ;;  %s2322_s17 = sld [smem:[#allocation4 + $0x1e]] }
  0x3e   :  { %1175 = vmatpush1.bf16.msra.mxu0 %v1174_v57  ;;  %v613_v46 = vadd.f32 %v609_v56, %v599_v39  ;;  %v631_v3 = vmul.f32 %v627_v59, %v1510_v50  ;;  %v795_v18 = vmul.f32 %v1522_v62, %v1327_v10  ;;  %v633_v23 = vmul.f32 %v629_v61, %v1512_v52 }
  0x3f   :  { %v615_v21 = vadd.f32 %v611_v60, %v601_v48  ;;  %v797_v24 = vmul.f32 %v1522_v62, %v1331_v11  ;;  %v1531_v25 = vstv %s1490_s18  ;;  %vm54_vm10 = vcmp.lt.f32.partialorder %v1306_v2, %v1323_v9  ;;  %s2414_s18 = sld [smem:[#allocation2 + $0xa]] }
  0x40   :  { %v1533_v19 = vadd.f32 %v631_v3, %v621_v45  ;;  %v799_v26 = vmul.f32 %v795_v18, %v613_v46  ;;  %v805_v27 = vmul.f32 %v1531_v25, %v365_v4  ;;  %v807_v20 = vmul.f32 %v1531_v25, %v367_v6  ;;  %vm58_vm12 = vmand %vm48_vm8, %vm54_vm10 }
  0x41   :  { %v1537_v28 = vadd.f32 %v633_v23, %v623_v63  ;;  %v801_v29 = vmul.f32 %v797_v24, %v615_v21  ;;  %vm56_vm11 = vcmp.lt.f32.partialorder %v1313_v5, %v1323_v9  ;;  %vm70_vm13 = vcmp.ge.f32.partialorder %v1306_v2, %v1323_v9 }
  0x42   :  { %v809_v10 = vmul.f32 %v805_v27, %v1533_v19  ;;  %vm72_vm14 = vcmp.ge.f32.partialorder %v1313_v5, %v1323_v9  ;;  %vm76_vm15 = vcmp.lt.f32.partialorder %v1306_v2, %v1345_v13  ;;  %vm60_vm0 = vmand %vm50_vm9, %vm56_vm11  ;;  %v1084_v4 = vsel %vm58_vm12, 1.0, %v1261_v17 }
  0x43   :  { %v811_v11 = vmul.f32 %v807_v20, %v1537_v28  ;;  %vm78_vm1 = vcmp.lt.f32.partialorder %v1313_v5, %v1345_v13  ;;  %vm92_vm2 = vcmp.ge.f32.partialorder %v1306_v2, %v1345_v13  ;;  %v1086_v30 = vsel %vm60_vm0, 1.0, %v1261_v17  ;;  %vm80_vm3 = vmand %vm70_vm13, %vm76_vm15 }
  0x44   :  { %v813_v6 = vadd.f32 %v809_v10, %v799_v26  ;;  %vm94_vm4 = vcmp.ge.f32.partialorder %v1313_v5, %v1345_v13  ;;  %vm98_vm5 = vcmp.lt.f32.partialorder %v1306_v2, %v1347_v14  ;;  %vm82_vm6 = vmand %vm72_vm14, %vm78_vm1  ;;  %v1089_v34 = vsel %vm80_vm3, 1.0, %v1261_v17 }
  0x45   :  { %v815_v33 = vadd.f32 %v811_v11, %v801_v29  ;;  %vm100_vm7 = vcmp.lt.f32.partialorder %v1313_v5, %v1347_v14  ;;  %vm114_vm8 = vcmp.ge.f32.partialorder %v1306_v2, %v1347_v14  ;;  %v1091_v35 = vsel %vm82_vm6, 1.0, %v1261_v17  ;;  %vm102_vm9 = vmand %vm92_vm2, %vm98_vm5 }
  0x46   :  { %vm116_vm10 = vcmp.ge.f32.partialorder %v1313_v5, %v1347_v14  ;;  %vm120_vm11 = vcmp.lt.f32.partialorder %v1306_v2, %v1349_v15  ;;  %vm122_vm12 = vcmp.lt.f32.partialorder %v1313_v5, %v1349_v15  ;;  %vm104_vm13 = vmand %vm94_vm4, %vm100_vm7  ;;  %v1094_v39 = vsel %vm102_vm9, 1.0, %v1261_v17 }
  0x47   :  { %v1176_v37 = vpack.c.bf16 %v815_v33, %v813_v6  ;;  %v1582_v41 = vsub.f32 %v1313_v5, %v1317_v8  ;;  %v296_v44 = vmul.f32 %v1351_v16, %v1335_v12  ;;  %v1096_v48 = vsel %vm104_vm13, 1.0, %v1261_v17  ;;  %vm124_vm14 = vmand %vm114_vm8, %vm120_vm11 }
  0x48   :  { %v304_v49 = vsub.f32 %v1345_v13, %v1306_v2  ;;  %v306_v53 = vsub.f32 %v1345_v13, %v1313_v5  ;;  %v1593_v54 = vsub.f32 %v1306_v2, %v1323_v9  ;;  %vm126_vm15 = vmand %vm116_vm10, %vm122_vm12  ;;  %v1596_v8 = vsel %vm124_vm14, 1.0, %v1261_v17 }
  0x49   :  { %1177 = vmatprep.subr.bf16.mxu0 %v1176_v37  ;;  %v298_v57 = vmul.f32 %v1351_v16, %v1582_v41  ;;  %v300_v56 = vmul.f32 %v1084_v4, %v296_v44  ;;  %v1602_v58 = vsub.f32 %v1313_v5, %v1323_v9  ;;  %v1605_v59 = vsel %vm126_vm15, 1.0, %v1261_v17 }
  0x4a   :  { %v310_v60 = vmul.f32 %v1430_v40, %v304_v49  ;;  %v312_v45 = vmul.f32 %v1430_v40, %v306_v53  ;;  %v326_v61 = vmul.f32 %v1593_v54, %v1430_v40  ;;  %v334_v16 = vsub.f32 %v1347_v14, %v1306_v2 }
  0x4b   :  { %v302_v46 = vmul.f32 %v1086_v30, %v298_v57  ;;  %v328_v63 = vmul.f32 %v1602_v58, %v1430_v40  ;;  %v336_v9 = vsub.f32 %v1347_v14, %v1313_v5  ;;  %v1619_v23 = vsub.f32 %v1306_v2, %v1345_v13 }
  0x4c   :  { %v314_v3 = vmul.f32 %v1089_v34, %v310_v60  ;;  %v316_v18 = vmul.f32 %v1091_v35, %v312_v45  ;;  %v330_v21 = vmul.f32 %v1089_v34, %v326_v61  ;;  %v340_v26 = vmul.f32 %v1449_v47, %v334_v16 }
  0x4d   :  { %v332_v24 = vmul.f32 %v1091_v35, %v328_v63  ;;  %v342_v27 = vmul.f32 %v1449_v47, %v336_v9  ;;  %v1625_v40 = vsub.f32 %v1313_v5, %v1345_v13  ;;  %v356_v10 = vmul.f32 %v1619_v23, %v1449_v47 }
  0x4e   :  { %v318_v20 = vadd.f32 %v314_v3, %v300_v56  ;;  %v320_v29 = vadd.f32 %v316_v18, %v302_v46  ;;  %v364_v11 = vsub.f32 %v1349_v15, %v1306_v2  ;;  %v344_v4 = vmul.f32 %v1094_v39, %v340_v26 }
  0x4f   :  { %v346_v6 = vmul.f32 %v1096_v48, %v342_v27  ;;  %v358_v30 = vmul.f32 %v1625_v40, %v1449_v47  ;;  %v366_v33 = vsub.f32 %v1349_v15, %v1313_v5  ;;  %v360_v34 = vmul.f32 %v1094_v39, %v356_v10 }
  0x50   :  { %v370_v13 = vmul.f32 %v1478_v7, %v364_v11  ;;  %v594_v35 = vmul.f32 %v1483_v22, %v1335_v12  ;;  %v596_v37 = vmul.f32 %v1483_v22, %v1582_v41  ;;  %v348_v44 = vadd.f32 %v344_v4, %v330_v21 }
  0x51   :  { %v350_v49 = vadd.f32 %v346_v6, %v332_v24  ;;  %v362_v53 = vmul.f32 %v1096_v48, %v358_v30  ;;  %v372_v57 = vmul.f32 %v1478_v7, %v366_v33  ;;  %v604_v39 = vmul.f32 %v1498_v31, %v334_v16 }
  0x52   :  { %v374_v47 = vmul.f32 %v1596_v8, %v370_v13  ;;  %v598_v56 = vmul.f32 %v594_v35, %v318_v20  ;;  %v600_v60 = vmul.f32 %v596_v37, %v320_v29  ;;  %v606_v61 = vmul.f32 %v1498_v31, %v336_v9 }
  0x53   :  { %v376_v45 = vmul.f32 %v1605_v59, %v372_v57  ;;  %v616_v22 = vmul.f32 %v1498_v31, %v1593_v54  ;;  %v618_v48 = vmul.f32 %v1498_v31, %v1602_v58  ;;  %v608_v63 = vmul.f32 %v604_v39, %v348_v44 }
  0x54   :  { %v1651_v46 = vadd.f32 %v374_v47, %v360_v34  ;;  %v626_v3 = vmul.f32 %v1501_v32, %v364_v11  ;;  %v628_v18 = vmul.f32 %v1501_v32, %v366_v33  ;;  %v610_v21 = vmul.f32 %v606_v61, %v350_v49 }
  0x55   :  { %v1657_v16 = vadd.f32 %v376_v45, %v362_v53  ;;  %v620_v24 = vmul.f32 %v616_v22, %v348_v44  ;;  %v622_v9 = vmul.f32 %v618_v48, %v350_v49  ;;  %v612_v26 = vadd.f32 %v608_v63, %v598_v56 }
  0x56   :  { %v630_v27 = vmul.f32 %v626_v3, %v1651_v46  ;;  %v794_v31 = vmul.f32 %v1522_v62, %v1335_v12  ;;  %v796_v20 = vmul.f32 %v1522_v62, %v1582_v41  ;;  %v614_v29 = vadd.f32 %v610_v21, %v600_v60 }
  0x57   :  { %v632_v10 = vmul.f32 %v628_v18, %v1657_v16  ;;  %v804_v4 = vmul.f32 %v1531_v25, %v364_v11  ;;  %v806_v6 = vmul.f32 %v1531_v25, %v366_v33  ;;  %vm137_vm0 = vcmp.ge.f32.partialorder %v1296_v0, %v1349_v15 }
  0x58   :  { %v1669_v30 = vadd.f32 %v630_v27, %v620_v24  ;;  %v798_v34 = vmul.f32 %v794_v31, %v612_v26  ;;  %vm139_vm1 = vcmp.ge.f32.partialorder %v1301_v1, %v1349_v15  ;;  %v800_v62 = vmul.f32 %v796_v20, %v614_v29 }
  0x59   :  { %v1675_v12 = vadd.f32 %v632_v10, %v622_v9  ;;  %v1678_v41 = vstv %s1641_s19  ;;  %v1682_v11 = vsub.f32 %v1296_v0, %v1347_v14  ;;  %v1691_v13 = vsub.f32 %v1301_v1, %v1347_v14  ;;  %s2431_s19 = sld [smem:[#allocation4 + $0x9]] }
  0x5a   :  { %v808_v33 = vmul.f32 %v804_v4, %v1669_v30  ;;  %vm143_vm2 = vcmp.lt.f32.partialorder %v1296_v0, %v1678_v41  ;;  %vm145_vm3 = vcmp.lt.f32.partialorder %v1301_v1, %v1678_v41  ;;  %v395_v44 = vsub.f32 %v1678_v41, %v1296_v0 }
  0x5b   :  { %v810_v35 = vmul.f32 %v806_v6, %v1675_v12  ;;  %vm147_vm4 = vmand %vm137_vm0, %vm143_vm2  ;;  %v387_v37 = vmul.f32 %v1682_v11, %v1478_v7  ;;  %v397_v49 = vsub.f32 %v1678_v41, %v1301_v1  ;;  %v389_v47 = vmul.f32 %v1691_v13, %v1478_v7 }
  0x5c   :  { %v812_v53 = vadd.f32 %v808_v33, %v798_v34  ;;  %vm149_vm5 = vmand %vm139_vm1, %vm145_vm3  ;;  %v1706_v57 = vsel %vm147_vm4, 1.0, %v1261_v17  ;;  %v1711_v56 = vstv %s1655_s20  ;;  %v639_v63 = vmul.f32 %v1501_v32, %v1461_v51  ;;  %s2447_s20 = sld [smem:[#allocation4 + $0x14]] }
  0x5d   :  { %v814_v60 = vadd.f32 %v810_v35, %v800_v62  ;;  %v1714_v39 = vsel %vm149_vm5, 1.0, %v1261_v17  ;;  %v391_v45 = vmul.f32 %v1420_v36, %v387_v37  ;;  %v401_v61 = vmul.f32 %v1711_v56, %v395_v44 }
  0x5e   :  { %v393_v22 = vmul.f32 %v1425_v38, %v389_v47  ;;  %v403_v48 = vmul.f32 %v1711_v56, %v397_v49  ;;  %v641_v3 = vmul.f32 %v1501_v32, %v1467_v55  ;;  %v1726_v24 = vstv %s1667_s21  ;;  %s2474_s21 = sld [smem:[#allocation4 + $0x1f]] }
  0x5f   :  { %v1178_v18 = vpack.c.bf16 %v814_v60, %v812_v53  ;;  %v405_v21 = vmul.f32 %v1706_v57, %v401_v61  ;;  %v817_v36 = vmul.f32 %v1531_v25, %v1437_v42  ;;  %v643_v38 = vmul.f32 %v639_v63, %v1510_v50 }
  0x60   :  { %v407_v9 = vmul.f32 %v1714_v39, %v403_v48  ;;  %v645_v26 = vmul.f32 %v641_v3, %v1512_v52  ;;  %v649_v27 = vmul.f32 %v1726_v24, %v395_v44  ;;  %v651_v20 = vmul.f32 %v1726_v24, %v397_v49 }
  0x61   :  { %1179 = vmatpush1.bf16.msra.mxu0 %v1178_v18  ;;  %v1734_v31 = vadd.f32 %v405_v21, %v391_v45  ;;  %v819_v29 = vmul.f32 %v1531_v25, %v1441_v43  ;;  %v821_v10 = vmul.f32 %v817_v36, %v1533_v19  ;;  %v1743_v42 = vstv %s1693_s22  ;;  %s2566_s22 = sld [smem:[#allocation2 + $0xb]] }
  0x62   :  { %v1740_v4 = vadd.f32 %v407_v9, %v393_v22  ;;  %vm136_vm6 = vcmp.ge.f32.partialorder %v1306_v2, %v1349_v15  ;;  %vm138_vm7 = vcmp.ge.f32.partialorder %v1313_v5, %v1349_v15  ;;  %v827_v6 = vmul.f32 %v1743_v42, %v395_v44 }
  0x63   :  { %v653_v50 = vmul.f32 %v649_v27, %v1734_v31  ;;  %v823_v52 = vmul.f32 %v819_v29, %v1537_v28  ;;  %v829_v43 = vmul.f32 %v1743_v42, %v397_v49  ;;  %vm142_vm8 = vcmp.lt.f32.partialorder %v1306_v2, %v1678_v41 }
  0x64   :  { %v655_v19 = vmul.f32 %v651_v20, %v1740_v4  ;;  %vm144_vm9 = vcmp.lt.f32.partialorder %v1313_v5, %v1678_v41  ;;  %v1760_v34 = vsub.f32 %v1306_v2, %v1347_v14  ;;  %vm146_vm10 = vmand %vm136_vm6, %vm142_vm8  ;;  %v1766_v28 = vsub.f32 %v1313_v5, %v1347_v14 }
  0x65   :  { %v1762_v62 = vadd.f32 %v653_v50, %v643_v38  ;;  %v394_v33 = vsub.f32 %v1678_v41, %v1306_v2  ;;  %v396_v35 = vsub.f32 %v1678_v41, %v1313_v5  ;;  %vm148_vm11 = vmand %vm138_vm7, %vm144_vm9  ;;  %v1778_v44 = vsel %vm146_vm10, 1.0, %v1261_v17 }
  0x66   :  { %v1772_v37 = vadd.f32 %v655_v19, %v645_v26  ;;  %v386_v49 = vmul.f32 %v1760_v34, %v1478_v7  ;;  %v638_v14 = vmul.f32 %v1501_v32, %v1619_v23  ;;  %v1788_v47 = vsel %vm148_vm11, 1.0, %v1261_v17 }
  0x67   :  { %v831_v53 = vmul.f32 %v827_v6, %v1762_v62  ;;  %v388_v60 = vmul.f32 %v1766_v28, %v1478_v7  ;;  %v400_v45 = vmul.f32 %v1711_v56, %v394_v33  ;;  %v402_v48 = vmul.f32 %v1711_v56, %v396_v35 }
  0x68   :  { %v833_v61 = vmul.f32 %v829_v43, %v1772_v37  ;;  %v390_v22 = vmul.f32 %v1596_v8, %v386_v49  ;;  %v640_v63 = vmul.f32 %v1501_v32, %v1625_v40  ;;  %v642_v36 = vmul.f32 %v638_v14, %v1651_v46 }
  0x69   :  { %v835_v3 = vadd.f32 %v831_v53, %v821_v10  ;;  %v392_v18 = vmul.f32 %v1605_v59, %v388_v60  ;;  %v404_v21 = vmul.f32 %v1778_v44, %v400_v45  ;;  %v406_v9 = vmul.f32 %v1788_v47, %v402_v48 }
  0x6a   :  { %v837_v7 = vadd.f32 %v833_v61, %v823_v52  ;;  %v644_v38 = vmul.f32 %v640_v63, %v1657_v16  ;;  %v648_v8 = vmul.f32 %v1726_v24, %v394_v33  ;;  %v650_v32 = vmul.f32 %v1726_v24, %v396_v35 }
  0x6b   :  { %v1806_v26 = vadd.f32 %v404_v21, %v390_v22  ;;  %v816_v59 = vmul.f32 %v1531_v25, %v1593_v54  ;;  %v818_v46 = vmul.f32 %v1531_v25, %v1602_v58  ;;  %v1813_v20 = vadd.f32 %v406_v9, %v392_v18 }
  0x6c   :  { %v1180_v27 = vpack.c.bf16 %v837_v7, %v835_v3  ;;  %v826_v29 = vmul.f32 %v1743_v42, %v394_v33  ;;  %v828_v16 = vmul.f32 %v1743_v42, %v396_v35  ;;  %vm159_vm12 = vcmp.ge.f32.partialorder %v1296_v0, %v1678_v41 }
  0x6d   :  { %v652_v10 = vmul.f32 %v648_v8, %v1806_v26  ;;  %v820_v50 = vmul.f32 %v816_v59, %v1669_v30  ;;  %v822_v52 = vmul.f32 %v818_v46, %v1675_v12  ;;  %v654_v25 = vmul.f32 %v650_v32, %v1813_v20 }
  0x6e   :  { %1181 = vmatprep.subr.bf16.mxu0 %v1180_v27  ;;  %vm161_vm13 = vcmp.ge.f32.partialorder %v1301_v1, %v1678_v41  ;;  %v1828_v54 = vstv %s1784_s23  ;;  %v1832_v58 = vsub.f32 %v1296_v0, %v1349_v15  ;;  %v1842_v30 = vsub.f32 %v1301_v1, %v1349_v15  ;;  %s2568_s23 = sld [smem:[#allocation4 + $0xa]] }
  0x6f   :  { %v1834_v6 = vadd.f32 %v652_v10, %v642_v36  ;;  %vm165_vm14 = vcmp.lt.f32.partialorder %v1296_v0, %v1828_v54  ;;  %vm167_vm15 = vcmp.lt.f32.partialorder %v1301_v1, %v1828_v54  ;;  %v1846_v12 = vadd.f32 %v654_v25, %v644_v38 }
  0x70   :  { %vm169_vm0 = vmand %vm159_vm12, %vm165_vm14  ;;  %v417_v43 = vmul.f32 %v1832_v58, %v1711_v56  ;;  %v425_v19 = vsub.f32 %v1828_v54, %v1296_v0  ;;  %v427_v33 = vsub.f32 %v1828_v54, %v1301_v1  ;;  %v419_v14 = vmul.f32 %v1842_v30, %v1711_v56 }
  0x71   :  { %v830_v35 = vmul.f32 %v826_v29, %v1834_v6  ;;  %vm171_vm1 = vmand %vm161_vm13, %vm167_vm15  ;;  %v1856_v49 = vsel %vm169_vm0, 1.0, %v1261_v17  ;;  %v1861_v53 = vstv %s1801_s0  ;;  %v832_v60 = vmul.f32 %v828_v16, %v1846_v12  ;;  %s2598_s0 = sld [smem:[#allocation4 + $0x15]] }
  0x72   :  { %v1865_v45 = vsel %vm171_vm1, 1.0, %v1261_v17  ;;  %v421_v61 = vmul.f32 %v1706_v57, %v417_v43  ;;  %v431_v22 = vmul.f32 %v1861_v53, %v425_v19  ;;  %v423_v63 = vmul.f32 %v1714_v39, %v419_v14 }
  0x73   :  { %v834_v48 = vadd.f32 %v830_v35, %v820_v50  ;;  %v433_v3 = vmul.f32 %v1861_v53, %v427_v33  ;;  %v661_v18 = vmul.f32 %v1726_v24, %v1682_v11  ;;  %v836_v21 = vadd.f32 %v832_v60, %v822_v52 }
  0x74   :  { %v435_v36 = vmul.f32 %v1856_v49, %v431_v22  ;;  %v663_v7 = vmul.f32 %v1726_v24, %v1691_v13  ;;  %v1877_v9 = vstv %s1817_s1  ;;  %v839_v27 = vmul.f32 %v1743_v42, %v1461_v51  ;;  %s2619_s1 = sld [smem:[#allocation4 + $0x20]] }
  0x75   :  { %v437_v57 = vmul.f32 %v1865_v45, %v433_v3  ;;  %v665_v38 = vmul.f32 %v661_v18, %v1734_v31  ;;  %v671_v39 = vmul.f32 %v1877_v9, %v425_v19  ;;  %v673_v8 = vmul.f32 %v1877_v9, %v427_v33 }
  0x76   :  { %v1182_v32 = vpack.c.bf16 %v836_v21, %v834_v48  ;;  %v1883_v59 = vadd.f32 %v435_v36, %v421_v61  ;;  %v667_v46 = vmul.f32 %v663_v7, %v1740_v4  ;;  %v841_v16 = vmul.f32 %v1743_v42, %v1467_v55 }
  0x77   :  { %v1888_v29 = vadd.f32 %v437_v57, %v423_v63  ;;  %v1893_v10 = vstv %s1844_s24  ;;  %vm158_vm2 = vcmp.ge.f32.partialorder %v1306_v2, %v1678_v41  ;;  %v843_v50 = vmul.f32 %v839_v27, %v1762_v62 }
  0x78   :  { %1183 = vmatpush1.bf16.msra.mxu0 %v1182_v32  ;;  %v675_v31 = vmul.f32 %v671_v39, %v1883_v59  ;;  %v849_v4 = vmul.f32 %v1893_v10, %v425_v19  ;;  %v851_v52 = vmul.f32 %v1893_v10, %v427_v33  ;;  %v845_v25 = vmul.f32 %v841_v16, %v1772_v37 }
  0x79   :  { %v677_v51 = vmul.f32 %v673_v8, %v1888_v29  ;;  %vm160_vm3 = vcmp.ge.f32.partialorder %v1313_v5, %v1678_v41  ;;  %vm164_vm4 = vcmp.lt.f32.partialorder %v1306_v2, %v1828_v54  ;;  %vm166_vm5 = vcmp.lt.f32.partialorder %v1313_v5, %v1828_v54 }
  0x7a   :  { %v1907_v55 = vadd.f32 %v675_v31, %v665_v38  ;;  %vm168_vm6 = vmand %vm158_vm2, %vm164_vm4  ;;  %v1913_v62 = vsub.f32 %v1306_v2, %v1349_v15  ;;  %v1917_v43 = vsub.f32 %v1313_v5, %v1349_v15  ;;  %v424_v33 = vsub.f32 %v1828_v54, %v1306_v2 }
  0x7b   :  { %v1919_v37 = vadd.f32 %v677_v51, %v667_v46  ;;  %vm170_vm7 = vmand %vm160_vm3, %vm166_vm5  ;;  %v1922_v19 = vsel %vm168_vm6, 1.0, %v1261_v17  ;;  %v426_v35 = vsub.f32 %v1828_v54, %v1313_v5  ;;  %v660_v3 = vmul.f32 %v1726_v24, %v1760_v34 }
  0x7c   :  { %v853_v14 = vmul.f32 %v849_v4, %v1907_v55  ;;  %v1930_v60 = vsel %vm170_vm7, 1.0, %v1261_v17  ;;  %v416_v15 = vmul.f32 %v1913_v62, %v1711_v56  ;;  %v418_v61 = vmul.f32 %v1917_v43, %v1711_v56 }
  0x7d   :  { %v855_v22 = vmul.f32 %v851_v52, %v1919_v37  ;;  %v430_v48 = vmul.f32 %v1861_v53, %v424_v33  ;;  %v432_v63 = vmul.f32 %v1861_v53, %v426_v35  ;;  %v662_v56 = vmul.f32 %v1726_v24, %v1766_v28 }
  0x7e   :  { %v857_v18 = vadd.f32 %v853_v14, %v843_v50  ;;  %v420_v21 = vmul.f32 %v1778_v44, %v416_v15  ;;  %v422_v36 = vmul.f32 %v1788_v47, %v418_v61  ;;  %v664_v39 = vmul.f32 %v660_v3, %v1806_v26 }
  0x7f   :  { %v859_v7 = vadd.f32 %v855_v22, %v845_v25  ;;  %v434_v57 = vmul.f32 %v1922_v19, %v430_v48  ;;  %v436_v38 = vmul.f32 %v1930_v60, %v432_v63  ;;  %v666_v8 = vmul.f32 %v662_v56, %v1813_v20 }
  0x80   :  { %v670_v32 = vmul.f32 %v1877_v9, %v424_v33  ;;  %v672_v46 = vmul.f32 %v1877_v9, %v426_v35  ;;  %v838_v44 = vmul.f32 %v1743_v42, %v1619_v23  ;;  %v840_v16 = vmul.f32 %v1743_v42, %v1625_v40 }
  0x81   :  { %v1184_v47 = vpack.c.bf16 %v859_v7, %v857_v18  ;;  %v1957_v27 = vadd.f32 %v434_v57, %v420_v21  ;;  %v1959_v24 = vadd.f32 %v436_v38, %v422_v36  ;;  %v848_v20 = vmul.f32 %v1893_v10, %v424_v33 }
  0x82   :  { %v842_v26 = vmul.f32 %v838_v44, %v1834_v6  ;;  %v850_v31 = vmul.f32 %v1893_v10, %v426_v35  ;;  %vm181_vm8 = vcmp.ge.f32.partialorder %v1296_v0, %v1828_v54  ;;  %v844_v4 = vmul.f32 %v840_v16, %v1846_v12 }
  0x83   :  { %1185 = vmatprep.subr.bf16.mxu0 %v1184_v47  ;;  %v674_v23 = vmul.f32 %v670_v32, %v1957_v27  ;;  %v676_v50 = vmul.f32 %v672_v46, %v1959_v24  ;;  %vm183_vm9 = vcmp.ge.f32.partialorder %v1301_v1, %v1828_v54  ;;  %v1976_v40 = vstv %s1936_s25 }
  0x84   :  { %v1980_v42 = vsub.f32 %v1296_v0, %v1678_v41  ;;  %v1984_v6 = vsub.f32 %v1301_v1, %v1678_v41  ;;  %v1987_v52 = vstv %s1938_s26  ;;  %vm187_vm10 = vcmp.lt.f32.partialorder %v1296_v0, %v1976_v40 }
  0x85   :  { %v1989_v51 = vadd.f32 %v674_v23, %v664_v39  ;;  %v1991_v25 = vadd.f32 %v676_v50, %v666_v8  ;;  %vm189_vm11 = vcmp.lt.f32.partialorder %v1301_v1, %v1976_v40  ;;  %vm191_vm12 = vmand %vm181_vm8, %vm187_vm10  ;;  %v455_v35 = vsub.f32 %v1976_v40, %v1296_v0  ;;  %v2077_v23 = vld [vmem:[%s2702_s2 + $0x10] sm:$0xff] }
  0x86   :  { %v447_v12 = vmul.f32 %v1980_v42, %v1861_v53  ;;  %v449_v33 = vmul.f32 %v1984_v6, %v1861_v53  ;;  %v457_v14 = vsub.f32 %v1976_v40, %v1301_v1  ;;  %vm193_vm13 = vmand %vm183_vm9, %vm189_vm11  ;;  %v2016_v22 = vsel %vm191_vm12, 1.0, %v1261_v17 }
  0x87   :  { %v852_v15 = vmul.f32 %v848_v20, %v1989_v51  ;;  %v854_v61 = vmul.f32 %v850_v31, %v1991_v25  ;;  %v683_v48 = vmul.f32 %v1877_v9, %v1832_v58  ;;  %v2021_v0 = vsel %vm193_vm13, 1.0, %v1261_v17  ;;  %v2062_v31 = vld [vmem:[%s2702_s2] sm:$0xff] }
  0x88   :  { %v451_v63 = vmul.f32 %v1856_v49, %v447_v12  ;;  %v453_v3 = vmul.f32 %v1865_v45, %v449_v33  ;;  %v461_v18 = vmul.f32 %v1987_v52, %v455_v35  ;;  %v463_v1 = vmul.f32 %v1987_v52, %v457_v14 }
  0x89   :  { %v856_v21 = vadd.f32 %v852_v15, %v842_v26  ;;  %v858_v36 = vadd.f32 %v854_v61, %v844_v4  ;;  %v685_v56 = vmul.f32 %v1877_v9, %v1842_v30  ;;  %v687_v57 = vmul.f32 %v683_v48, %v1883_v59 }
  0x8a   :  { %v465_v7 = vmul.f32 %v2016_v22, %v461_v18  ;;  %v2032_v38 = vstv %s1968_s27  ;;  %v861_v49 = vmul.f32 %v1893_v10, %v1682_v11  ;;  %v467_v39 = vmul.f32 %v2021_v0, %v463_v1 }
  0x8b   :  { %v1186_v45 = vpack.c.bf16 %v858_v36, %v856_v21  ;;  %v689_v8 = vmul.f32 %v685_v56, %v1888_v29  ;;  %v693_v32 = vmul.f32 %v2032_v38, %v455_v35  ;;  %v695_v44 = vmul.f32 %v2032_v38, %v457_v14 }
  0x8c   :  { %v2039_v46 = vadd.f32 %v465_v7, %v451_v63  ;;  %v863_v47 = vmul.f32 %v1893_v10, %v1691_v13  ;;  %v865_v59 = vmul.f32 %v861_v49, %v1907_v55  ;;  %v2045_v16 = vadd.f32 %v467_v39, %v453_v3 }
  0x8d   :  { %1187 = vmatpush1.bf16.msra.mxu0 %v1186_v45  ;;  %v2048_v11 = vstv %s1997_s28  ;;  %vm180_vm14 = vcmp.ge.f32.partialorder %v1306_v2, %v1828_v54  ;;  %vm182_vm15 = vcmp.ge.f32.partialorder %v1313_v5, %v1828_v54  ;;  %vm186_vm0 = vcmp.lt.f32.partialorder %v2062_v31, %v1976_v40 }
  0x8e   :  { %v697_v29 = vmul.f32 %v693_v32, %v2039_v46  ;;  %v867_v26 = vmul.f32 %v863_v47, %v1919_v37  ;;  %v871_v20 = vmul.f32 %v2048_v11, %v455_v35  ;;  %v873_v13 = vmul.f32 %v2048_v11, %v457_v14  ;;  %vm190_vm2 = vmand %vm180_vm14, %vm186_vm0 }
  0x8f   :  { %v699_v55 = vmul.f32 %v695_v44, %v2045_v16  ;;  %vm188_vm1 = vcmp.lt.f32.partialorder %v1313_v5, %v1976_v40  ;;  %v2070_v2 = vsub.f32 %v2062_v31, %v1678_v41  ;;  %v2081_v50 = vsub.f32 %v2077_v23, %v1678_v41 }
  0x90   :  { %v2072_v37 = vadd.f32 %v697_v29, %v687_v57  ;;  %v454_v4 = vsub.f32 %v1976_v40, %v2062_v31  ;;  %v456_v12 = vsub.f32 %v1976_v40, %v2077_v23  ;;  %vm192_vm3 = vmand %vm182_vm15, %vm188_vm1  ;;  %v2093_v35 = vsel %vm190_vm2, 1.0, %v1261_v17 }
  0x91   :  { %v2087_v33 = vadd.f32 %v699_v55, %v689_v8  ;;  %v446_v14 = vmul.f32 %v2070_v2, %v1861_v53  ;;  %v682_v41 = vmul.f32 %v1877_v9, %v1913_v62  ;;  %v2103_v61 = vsel %vm192_vm3, 1.0, %v1261_v17 }
  0x92   :  { %v875_v15 = vmul.f32 %v871_v20, %v2072_v37  ;;  %v448_v5 = vmul.f32 %v2081_v50, %v1861_v53  ;;  %v460_v48 = vmul.f32 %v1987_v52, %v454_v4  ;;  %v462_v18 = vmul.f32 %v1987_v52, %v456_v12 }
  0x93   :  { %v877_v63 = vmul.f32 %v873_v13, %v2087_v33  ;;  %v450_v3 = vmul.f32 %v1922_v19, %v446_v14  ;;  %v684_v21 = vmul.f32 %v1877_v9, %v1917_v43  ;;  %v686_v7 = vmul.f32 %v682_v41, %v1957_v27 }
  0x94   :  { %v879_v36 = vadd.f32 %v875_v15, %v865_v59  ;;  %v452_v1 = vmul.f32 %v1930_v60, %v448_v5  ;;  %v464_v56 = vmul.f32 %v2093_v35, %v460_v48  ;;  %v466_v57 = vmul.f32 %v2103_v61, %v462_v18 }
  0x95   :  { %v881_v53 = vadd.f32 %v877_v63, %v867_v26  ;;  %v688_v49 = vmul.f32 %v684_v21, %v1959_v24  ;;  %v692_v19 = vmul.f32 %v2032_v38, %v454_v4  ;;  %v694_v9 = vmul.f32 %v2032_v38, %v456_v12 }
  0x96   :  { %v2121_v45 = vadd.f32 %v464_v56, %v450_v3  ;;  %v860_v60 = vmul.f32 %v1893_v10, %v1760_v34  ;;  %v862_v27 = vmul.f32 %v1893_v10, %v1766_v28  ;;  %v2128_v8 = vadd.f32 %v466_v57, %v452_v1  ;;  %v2140_v34 = vld [vmem:[%s2702_s2 + $0x8] sm:$0xff]  ;;  %v2148_v10 = vld [vmem:[%s2702_s2 + $0x18] sm:$0xff]  ;;  %s2169_s2 = sld [smem:[#allocation4 + $0x1d]] }
  0x97   :  { %v1188_v39 = vpack.c.bf16 %v881_v53, %v879_v36  ;;  %v870_v32 = vmul.f32 %v2048_v11, %v454_v4  ;;  %v872_v24 = vmul.f32 %v2048_v11, %v456_v12  ;;  %vm203_vm4 = vcmp.ge.f32.partialorder %v2140_v34, %v1976_v40 }
  0x98   :  { %v696_v44 = vmul.f32 %v692_v19, %v2121_v45  ;;  %v864_v47 = vmul.f32 %v860_v60, %v1989_v51  ;;  %v866_v59 = vmul.f32 %v862_v27, %v1991_v25  ;;  %v698_v28 = vmul.f32 %v694_v9, %v2128_v8 }
  0x99   :  { %1189 = vmatprep.subr.bf16.mxu0 %v1188_v39  ;;  %vm205_vm5 = vcmp.ge.f32.partialorder %v2148_v10, %v1976_v40  ;;  %v2153_v51 = vstv %s2099_s7  ;;  %v2157_v25 = vsub.f32 %v2140_v34, %v1828_v54  ;;  %v2167_v26 = vsub.f32 %v2148_v10, %v1828_v54 }
  0x9a   :  { %v2159_v29 = vadd.f32 %v696_v44, %v686_v7  ;;  %vm209_vm6 = vcmp.lt.f32.partialorder %v2140_v34, %v2153_v51  ;;  %vm211_vm7 = vcmp.lt.f32.partialorder %v2148_v10, %v2153_v51  ;;  %v2171_v20 = vadd.f32 %v698_v28, %v688_v49 }
  0x9b   :  { %vm213_vm8 = vmand %vm203_vm4, %vm209_vm6  ;;  %v477_v13 = vmul.f32 %v2157_v25, %v1987_v52  ;;  %v485_v55 = vsub.f32 %v2153_v51, %v2140_v34  ;;  %v487_v4 = vsub.f32 %v2153_v51, %v2148_v10  ;;  %v479_v41 = vmul.f32 %v2167_v26, %v1987_v52 }
  0x9c   :  { %v874_v12 = vmul.f32 %v870_v32, %v2159_v29  ;;  %vm215_vm9 = vmand %vm205_vm5, %vm211_vm7  ;;  %v2181_v14 = vsel %vm213_vm8, 1.0, %v1261_v17  ;;  %v2186_v15 = vstv %s2116_s8  ;;  %v876_v5 = vmul.f32 %v872_v24, %v2171_v20 }
  0x9d   :  { %v2190_v48 = vsel %vm215_vm9, 1.0, %v1261_v17  ;;  %v481_v63 = vmul.f32 %v2016_v22, %v477_v13  ;;  %v491_v3 = vmul.f32 %v2186_v15, %v485_v55  ;;  %v483_v21 = vmul.f32 %v2021_v0, %v479_v41 }
  0x9e   :  { %v878_v18 = vadd.f32 %v874_v12, %v864_v47  ;;  %v493_v36 = vmul.f32 %v2186_v15, %v487_v4  ;;  %v705_v1 = vmul.f32 %v2032_v38, %v1980_v42  ;;  %v880_v56 = vadd.f32 %v876_v5, %v866_v59 }
  0x9f   :  { %v495_v7 = vmul.f32 %v2181_v14, %v491_v3  ;;  %v707_v53 = vmul.f32 %v2032_v38, %v1984_v6  ;;  %v2202_v57 = vstv %s2132_s9  ;;  %v883_v39 = vmul.f32 %v2048_v11, %v1832_v58 }
  0xa0   :  { %v497_v22 = vmul.f32 %v2190_v48, %v493_v36  ;;  %v709_v49 = vmul.f32 %v705_v1, %v2039_v46  ;;  %v715_v0 = vmul.f32 %v2202_v57, %v485_v55  ;;  %v717_v19 = vmul.f32 %v2202_v57, %v487_v4 }
  0xa1   :  { %v1190_v9 = vpack.c.bf16 %v880_v56, %v878_v18  ;;  %v2208_v60 = vadd.f32 %v495_v7, %v481_v63  ;;  %v711_v27 = vmul.f32 %v707_v53, %v2045_v16  ;;  %v885_v24 = vmul.f32 %v2048_v11, %v1842_v30 }
  0xa2   :  { %v2213_v32 = vadd.f32 %v497_v22, %v483_v21  ;;  %v2218_v44 = vstv %s2169_s2  ;;  %vm202_vm10 = vcmp.ge.f32.partialorder %v2062_v31, %v1976_v40  ;;  %v887_v47 = vmul.f32 %v883_v39, %v2072_v37 }
  0xa3   :  { %1191 = vmatpush1.bf16.msra.mxu0 %v1190_v9  ;;  %v719_v46 = vmul.f32 %v715_v0, %v2208_v60  ;;  %v893_v16 = vmul.f32 %v2218_v44, %v485_v55  ;;  %v895_v59 = vmul.f32 %v2218_v44, %v487_v4  ;;  %v889_v28 = vmul.f32 %v885_v24, %v2087_v33 }
  0xa4   :  { %v721_v58 = vmul.f32 %v717_v19, %v2213_v32  ;;  %vm204_vm11 = vcmp.ge.f32.partialorder %v2077_v23, %v1976_v40  ;;  %vm208_vm12 = vcmp.lt.f32.partialorder %v2062_v31, %v2153_v51  ;;  %vm210_vm13 = vcmp.lt.f32.partialorder %v2077_v23, %v2153_v51 }
  0xa5   :  { %v2232_v30 = vadd.f32 %v719_v46, %v709_v49  ;;  %vm212_vm14 = vmand %vm202_vm10, %vm208_vm12  ;;  %v2238_v37 = vsub.f32 %v2062_v31, %v1828_v54  ;;  %v2242_v13 = vsub.f32 %v2077_v23, %v1828_v54  ;;  %v484_v4 = vsub.f32 %v2153_v51, %v2062_v31 }
  0xa6   :  { %v2244_v33 = vadd.f32 %v721_v58, %v711_v27  ;;  %vm214_vm15 = vmand %vm204_vm11, %vm210_vm13  ;;  %v2247_v55 = vsel %vm212_vm14, 1.0, %v1261_v17  ;;  %v486_v12 = vsub.f32 %v2153_v51, %v2077_v23  ;;  %v704_v36 = vmul.f32 %v2032_v38, %v2070_v2 }
  0xa7   :  { %v897_v41 = vmul.f32 %v893_v16, %v2232_v30  ;;  %v2255_v5 = vsel %vm214_vm15, 1.0, %v1261_v17  ;;  %v476_v54 = vmul.f32 %v2238_v37, %v1987_v52  ;;  %v478_v63 = vmul.f32 %v2242_v13, %v1987_v52 }
  0xa8   :  { %v899_v3 = vmul.f32 %v895_v59, %v2244_v33  ;;  %v490_v18 = vmul.f32 %v2186_v15, %v484_v4  ;;  %v492_v21 = vmul.f32 %v2186_v15, %v486_v12  ;;  %v706_v52 = vmul.f32 %v2032_v38, %v2081_v50 }
  0xa9   :  { %v901_v1 = vadd.f32 %v897_v41, %v887_v47  ;;  %v480_v56 = vmul.f32 %v2093_v35, %v476_v54  ;;  %v482_v7 = vmul.f32 %v2103_v61, %v478_v63  ;;  %v708_v0 = vmul.f32 %v704_v36, %v2121_v45 }
  0xaa   :  { %v903_v53 = vadd.f32 %v899_v3, %v889_v28  ;;  %v494_v22 = vmul.f32 %v2247_v55, %v490_v18  ;;  %v496_v49 = vmul.f32 %v2255_v5, %v492_v21  ;;  %v710_v19 = vmul.f32 %v706_v52, %v2128_v8 }
  0xab   :  { %v714_v9 = vmul.f32 %v2202_v57, %v484_v4  ;;  %v716_v27 = vmul.f32 %v2202_v57, %v486_v12  ;;  %v882_v35 = vmul.f32 %v2048_v11, %v1913_v62  ;;  %v884_v24 = vmul.f32 %v2048_v11, %v1917_v43 }
  0xac   :  { %v1192_v61 = vpack.c.bf16 %v903_v53, %v901_v1  ;;  %v2282_v39 = vadd.f32 %v494_v22, %v480_v56  ;;  %v2284_v38 = vadd.f32 %v496_v49, %v482_v7  ;;  %v892_v8 = vmul.f32 %v2218_v44, %v484_v4 }
  0xad   :  { %v886_v45 = vmul.f32 %v882_v35, %v2159_v29  ;;  %v894_v46 = vmul.f32 %v2218_v44, %v486_v12  ;;  %vm225_vm0 = vcmp.ge.f32.partialorder %v2140_v34, %v2153_v51  ;;  %v888_v16 = vmul.f32 %v884_v24, %v2171_v20 }
  0xae   :  { %1193 = vmatprep.subr.bf16.mxu0 %v1192_v61  ;;  %v718_v62 = vmul.f32 %v714_v9, %v2282_v39  ;;  %v720_v47 = vmul.f32 %v716_v27, %v2284_v38  ;;  %vm227_vm1 = vcmp.ge.f32.partialorder %v2148_v10, %v2153_v51  ;;  %v2301_v43 = vstv %s2261_s14 }
  0xaf   :  { %v2305_v11 = vsub.f32 %v2140_v34, %v1976_v40  ;;  %v2309_v29 = vsub.f32 %v2148_v10, %v1976_v40  ;;  %v2312_v59 = vstv %s2263_s15  ;;  %vm231_vm2 = vcmp.lt.f32.partialorder %v2140_v34, %v2301_v43 }
  0xb0   :  { %v2314_v58 = vadd.f32 %v718_v62, %v708_v0  ;;  %v2316_v28 = vadd.f32 %v720_v47, %v710_v19  ;;  %vm233_vm3 = vcmp.lt.f32.partialorder %v2148_v10, %v2301_v43  ;;  %vm235_vm4 = vmand %vm225_vm0, %vm231_vm2  ;;  %v515_v12 = vsub.f32 %v2301_v43, %v2140_v34 }
  0xb1   :  { %v507_v20 = vmul.f32 %v2305_v11, %v2186_v15  ;;  %v509_v4 = vmul.f32 %v2309_v29, %v2186_v15  ;;  %v517_v41 = vsub.f32 %v2301_v43, %v2148_v10  ;;  %vm237_vm5 = vmand %vm227_vm1, %vm233_vm3  ;;  %v2341_v3 = vsel %vm235_vm4, 1.0, %v1261_v17 }
  0xb2   :  { %v896_v54 = vmul.f32 %v892_v8, %v2314_v58  ;;  %v898_v63 = vmul.f32 %v894_v46, %v2316_v28  ;;  %v727_v18 = vmul.f32 %v2202_v57, %v2157_v25  ;;  %v2346_v21 = vsel %vm237_vm5, 1.0, %v1261_v17 }
  0xb3   :  { %v511_v36 = vmul.f32 %v2181_v14, %v507_v20  ;;  %v513_v1 = vmul.f32 %v2190_v48, %v509_v4  ;;  %v521_v56 = vmul.f32 %v2312_v59, %v515_v12  ;;  %v523_v53 = vmul.f32 %v2312_v59, %v517_v41 }
  0xb4   :  { %v900_v7 = vadd.f32 %v896_v54, %v886_v45  ;;  %v902_v52 = vadd.f32 %v898_v63, %v888_v16  ;;  %v729_v22 = vmul.f32 %v2202_v57, %v2167_v26  ;;  %v731_v0 = vmul.f32 %v727_v18, %v2208_v60 }
  0xb5   :  { %v525_v49 = vmul.f32 %v2341_v3, %v521_v56  ;;  %v2357_v19 = vstv %s2293_s16  ;;  %v905_v14 = vmul.f32 %v2218_v44, %v1980_v42  ;;  %v527_v9 = vmul.f32 %v2346_v21, %v523_v53 }
  0xb6   :  { %v1194_v48 = vpack.c.bf16 %v902_v52, %v900_v7  ;;  %v733_v27 = vmul.f32 %v729_v22, %v2213_v32  ;;  %v737_v35 = vmul.f32 %v2357_v19, %v515_v12  ;;  %v739_v24 = vmul.f32 %v2357_v19, %v517_v41 }
  0xb7   :  { %v2364_v61 = vadd.f32 %v525_v49, %v511_v36  ;;  %v907_v45 = vmul.f32 %v2218_v44, %v1984_v6  ;;  %v909_v60 = vmul.f32 %v905_v14, %v2232_v30  ;;  %v2370_v8 = vadd.f32 %v527_v9, %v513_v1 }
  0xb8   :  { %1195 = vmatpush1.bf16.msra.mxu0 %v1194_v48  ;;  %v2373_v42 = vstv %s2322_s17  ;;  %vm224_vm6 = vcmp.ge.f32.partialorder %v2062_v31, %v2153_v51  ;;  %vm226_vm7 = vcmp.ge.f32.partialorder %v2077_v23, %v2153_v51  ;;  %vm230_vm8 = vcmp.lt.f32.partialorder %v2062_v31, %v2301_v43 }
  0xb9   :  { %v741_v32 = vmul.f32 %v737_v35, %v2364_v61  ;;  %v911_v46 = vmul.f32 %v907_v45, %v2244_v33  ;;  %v915_v62 = vmul.f32 %v2373_v42, %v515_v12  ;;  %v917_v6 = vmul.f32 %v2373_v42, %v517_v41  ;;  %vm234_vm10 = vmand %vm224_vm6, %vm230_vm8 }
  0xba   :  { %v743_v30 = vmul.f32 %v739_v24, %v2370_v8  ;;  %vm232_vm9 = vcmp.lt.f32.partialorder %v2077_v23, %v2301_v43  ;;  %v2390_v47 = vsub.f32 %v2062_v31, %v1976_v40  ;;  %v2396_v33 = vsub.f32 %v2077_v23, %v1976_v40 }
  0xbb   :  { %v2392_v16 = vadd.f32 %v741_v32, %v731_v0  ;;  %v514_v20 = vsub.f32 %v2301_v43, %v2062_v31  ;;  %v516_v4 = vsub.f32 %v2301_v43, %v2077_v23  ;;  %vm236_vm11 = vmand %vm226_vm7, %vm232_vm9  ;;  %v2408_v41 = vsel %vm234_vm10, 1.0, %v1261_v17 }
  0xbc   :  { %v2402_v12 = vadd.f32 %v743_v30, %v733_v27  ;;  %v506_v54 = vmul.f32 %v2390_v47, %v2186_v15  ;;  %v726_v40 = vmul.f32 %v2202_v57, %v2238_v37  ;;  %v2418_v18 = vsel %vm236_vm11, 1.0, %v1261_v17 }
  0xbd   :  { %v919_v63 = vmul.f32 %v915_v62, %v2392_v16  ;;  %v508_v36 = vmul.f32 %v2396_v33, %v2186_v15  ;;  %v520_v1 = vmul.f32 %v2312_v59, %v514_v20  ;;  %v522_v52 = vmul.f32 %v2312_v59, %v516_v4 }
  0xbe   :  { %v921_v56 = vmul.f32 %v917_v6, %v2402_v12  ;;  %v510_v7 = vmul.f32 %v2247_v55, %v506_v54  ;;  %v728_v53 = vmul.f32 %v2202_v57, %v2242_v13  ;;  %v730_v14 = vmul.f32 %v726_v40, %v2282_v39 }
  0xbf   :  { %v923_v22 = vadd.f32 %v919_v63, %v909_v60  ;;  %v512_v49 = vmul.f32 %v2255_v5, %v508_v36  ;;  %v524_v0 = vmul.f32 %v2408_v41, %v520_v1  ;;  %v526_v48 = vmul.f32 %v2418_v18, %v522_v52 }
  0xc0   :  { %v925_v15 = vadd.f32 %v921_v56, %v911_v46  ;;  %v732_v9 = vmul.f32 %v728_v53, %v2284_v38  ;;  %v736_v55 = vmul.f32 %v2357_v19, %v514_v20  ;;  %v738_v57 = vmul.f32 %v2357_v19, %v516_v4 }
  0xc1   :  { %v2436_v27 = vadd.f32 %v524_v0, %v510_v7  ;;  %v904_v5 = vmul.f32 %v2218_v44, %v2070_v2  ;;  %v906_v39 = vmul.f32 %v2218_v44, %v2081_v50  ;;  %v2443_v24 = vadd.f32 %v526_v48, %v512_v49 }
  0xc2   :  { %v1196_v35 = vpack.c.bf16 %v925_v15, %v923_v22  ;;  %v914_v45 = vmul.f32 %v2373_v42, %v514_v20  ;;  %v916_v38 = vmul.f32 %v2373_v42, %v516_v4  ;;  %vm247_vm12 = vcmp.ge.f32.partialorder %v2140_v34, %v2301_v43 }
  0xc3   :  { %v740_v60 = vmul.f32 %v736_v55, %v2436_v27  ;;  %v908_v32 = vmul.f32 %v904_v5, %v2314_v58  ;;  %v910_v46 = vmul.f32 %v906_v39, %v2316_v28  ;;  %v742_v2 = vmul.f32 %v738_v57, %v2443_v24 }
  0xc4   :  { %1197 = vmatprep.subr.bf16.mxu0 %v1196_v35  ;;  %vm249_vm13 = vcmp.ge.f32.partialorder %v2148_v10, %v2301_v43  ;;  %v2458_v50 = vstv %s2414_s18  ;;  %v2462_v44 = vsub.f32 %v2140_v34, %v2153_v51  ;;  %v2472_v58 = vsub.f32 %v2148_v10, %v2153_v51 }
  0xc5   :  { %v2464_v62 = vadd.f32 %v740_v60, %v730_v14  ;;  %vm253_vm14 = vcmp.lt.f32.partialorder %v2140_v34, %v2458_v50  ;;  %vm255_vm15 = vcmp.lt.f32.partialorder %v2148_v10, %v2458_v50  ;;  %v2476_v28 = vadd.f32 %v742_v2, %v732_v9 }
  0xc6   :  { %vm257_vm0 = vmand %vm247_vm12, %vm253_vm14  ;;  %v537_v6 = vmul.f32 %v2462_v44, %v2312_v59  ;;  %v545_v30 = vsub.f32 %v2458_v50, %v2140_v34  ;;  %v547_v20 = vsub.f32 %v2458_v50, %v2148_v10  ;;  %v539_v40 = vmul.f32 %v2472_v58, %v2312_v59 }
  0xc7   :  { %v918_v4 = vmul.f32 %v914_v45, %v2464_v62  ;;  %vm259_vm1 = vmand %vm249_vm13, %vm255_vm15  ;;  %v2486_v54 = vsel %vm257_vm0, 1.0, %v1261_v17  ;;  %v2491_v63 = vstv %s2431_s19  ;;  %v920_v36 = vmul.f32 %v916_v38, %v2476_v28 }
  0xc8   :  { %v2495_v1 = vsel %vm259_vm1, 1.0, %v1261_v17  ;;  %v541_v56 = vmul.f32 %v2341_v3, %v537_v6  ;;  %v551_v7 = vmul.f32 %v2491_v63, %v545_v30  ;;  %v543_v53 = vmul.f32 %v2346_v21, %v539_v40 }
  0xc9   :  { %v922_v52 = vadd.f32 %v918_v4, %v908_v32  ;;  %v553_v22 = vmul.f32 %v2491_v63, %v547_v20  ;;  %v749_v49 = vmul.f32 %v2357_v19, %v2305_v11  ;;  %v924_v0 = vadd.f32 %v920_v36, %v910_v46 }
  0xca   :  { %v555_v14 = vmul.f32 %v2486_v54, %v551_v7  ;;  %v751_v15 = vmul.f32 %v2357_v19, %v2309_v29  ;;  %v2507_v48 = vstv %s2447_s20  ;;  %v927_v35 = vmul.f32 %v2373_v42, %v2157_v25 }
  0xcb   :  { %v557_v3 = vmul.f32 %v2495_v1, %v553_v22  ;;  %v753_v9 = vmul.f32 %v749_v49, %v2364_v61  ;;  %v759_v21 = vmul.f32 %v2507_v48, %v545_v30  ;;  %v761_v55 = vmul.f32 %v2507_v48, %v547_v20 }
  0xcc   :  { %v1198_v57 = vpack.c.bf16 %v924_v0, %v922_v52  ;;  %v2513_v5 = vadd.f32 %v555_v14, %v541_v56  ;;  %v755_v39 = vmul.f32 %v751_v15, %v2370_v8  ;;  %v929_v38 = vmul.f32 %v2373_v42, %v2167_v26 }
  0xcd   :  { %v2518_v45 = vadd.f32 %v557_v3, %v543_v53  ;;  %v2523_v60 = vstv %s2474_s21  ;;  %vm246_vm2 = vcmp.ge.f32.partialorder %v2062_v31, %v2301_v43  ;;  %v931_v32 = vmul.f32 %v927_v35, %v2392_v16 }
  0xce   :  { %1199 = vmatpush1.bf16.msra.mxu0 %v1198_v57  ;;  %v763_v61 = vmul.f32 %v759_v21, %v2513_v5  ;;  %v937_v8 = vmul.f32 %v2523_v60, %v545_v30  ;;  %v939_v46 = vmul.f32 %v2523_v60, %v547_v20  ;;  %v933_v2 = vmul.f32 %v929_v38, %v2402_v12 }
  0xcf   :  { %v765_v25 = vmul.f32 %v761_v55, %v2518_v45  ;;  %vm248_vm3 = vcmp.ge.f32.partialorder %v2077_v23, %v2301_v43  ;;  %vm252_vm4 = vcmp.lt.f32.partialorder %v2062_v31, %v2458_v50  ;;  %vm254_vm5 = vcmp.lt.f32.partialorder %v2077_v23, %v2458_v50 }
  0xd0   :  { %v2537_v26 = vadd.f32 %v763_v61, %v753_v9  ;;  %vm256_vm6 = vmand %vm246_vm2, %vm252_vm4  ;;  %v2543_v16 = vsub.f32 %v2062_v31, %v2153_v51  ;;  %v2547_v6 = vsub.f32 %v2077_v23, %v2153_v51  ;;  %v544_v20 = vsub.f32 %v2458_v50, %v2062_v31 }
  0xd1   :  { %v2549_v12 = vadd.f32 %v765_v25, %v755_v39  ;;  %vm258_vm7 = vmand %vm248_vm3, %vm254_vm5  ;;  %v2552_v30 = vsel %vm256_vm6, 1.0, %v1261_v17  ;;  %v546_v4 = vsub.f32 %v2458_v50, %v2077_v23  ;;  %v748_v22 = vmul.f32 %v2357_v19, %v2390_v47 }
  0xd2   :  { %v941_v40 = vmul.f32 %v937_v8, %v2537_v26  ;;  %v2560_v36 = vsel %vm258_vm7, 1.0, %v1261_v17  ;;  %v536_v51 = vmul.f32 %v2543_v16, %v2312_v59  ;;  %v538_v56 = vmul.f32 %v2547_v6, %v2312_v59 }
  0xd3   :  { %v943_v7 = vmul.f32 %v939_v46, %v2549_v12  ;;  %v550_v52 = vmul.f32 %v2491_v63, %v544_v20  ;;  %v552_v53 = vmul.f32 %v2491_v63, %v546_v4  ;;  %v750_v59 = vmul.f32 %v2357_v19, %v2396_v33 }
  0xd4   :  { %v945_v49 = vadd.f32 %v941_v40, %v931_v32  ;;  %v540_v0 = vmul.f32 %v2408_v41, %v536_v51  ;;  %v542_v14 = vmul.f32 %v2418_v18, %v538_v56  ;;  %v752_v21 = vmul.f32 %v748_v22, %v2436_v27 }
  0xd5   :  { %v947_v15 = vadd.f32 %v943_v7, %v933_v2  ;;  %v554_v3 = vmul.f32 %v2552_v30, %v550_v52  ;;  %v556_v9 = vmul.f32 %v2560_v36, %v552_v53  ;;  %v754_v55 = vmul.f32 %v750_v59, %v2443_v24 }
  0xd6   :  { %v758_v57 = vmul.f32 %v2507_v48, %v544_v20  ;;  %v760_v39 = vmul.f32 %v2507_v48, %v546_v4  ;;  %v926_v41 = vmul.f32 %v2373_v42, %v2238_v37  ;;  %v928_v38 = vmul.f32 %v2373_v42, %v2242_v13 }
  0xd7   :  { %v1200_v18 = vpack.c.bf16 %v947_v15, %v945_v49  ;;  %v2587_v35 = vadd.f32 %v554_v3, %v540_v0  ;;  %v2589_v19 = vadd.f32 %v556_v9, %v542_v14  ;;  %v936_v24 = vmul.f32 %v2523_v60, %v544_v20 }
  0xd8   :  { %v930_v27 = vmul.f32 %v926_v41, %v2464_v62  ;;  %v938_v61 = vmul.f32 %v2523_v60, %v546_v4  ;;  %vm269_vm8 = vcmp.ge.f32.partialorder %v2140_v34, %v2458_v50  ;;  %v932_v8 = vmul.f32 %v928_v38, %v2476_v28 }
  0xd9   :  { %1201 = vmatprep.subr.bf16.mxu0 %v1200_v18  ;;  %v762_v37 = vmul.f32 %v758_v57, %v2587_v35  ;;  %v764_v32 = vmul.f32 %v760_v39, %v2589_v19  ;;  %vm271_vm9 = vcmp.ge.f32.partialorder %v2148_v10, %v2458_v50  ;;  %v273_v13 = vstv %s2566_s22 }
  0xda   :  { %v563_v42 = vsub.f32 %v2140_v34, %v2301_v43  ;;  %v565_v62 = vsub.f32 %v2148_v10, %v2301_v43  ;;  %v2611_v46 = vstv %s2568_s23  ;;  %vm275_vm10 = vcmp.lt.f32.partialorder %v2140_v34, %v273_v13 }
  0xdb   :  { %v2613_v25 = vadd.f32 %v762_v37, %v752_v21  ;;  %v2615_v2 = vadd.f32 %v764_v32, %v754_v55  ;;  %vm277_vm11 = vcmp.lt.f32.partialorder %v2148_v10, %v273_v13  ;;  %vm279_vm12 = vmand %vm269_vm8, %vm275_vm10  ;;  %v575_v4 = vsub.f32 %v273_v13, %v2140_v34 }
  0xdc   :  { %v567_v28 = vmul.f32 %v563_v42, %v2491_v63  ;;  %v569_v20 = vmul.f32 %v565_v62, %v2491_v63  ;;  %v577_v40 = vsub.f32 %v273_v13, %v2148_v10  ;;  %vm281_vm13 = vmand %vm271_vm9, %vm277_vm11  ;;  %v1135_v7 = vsel %vm279_vm12, 1.0, %v1261_v17 }
  0xdd   :  { %v940_v51 = vmul.f32 %v936_v24, %v2613_v25  ;;  %v942_v56 = vmul.f32 %v938_v61, %v2615_v2  ;;  %v771_v52 = vmul.f32 %v2507_v48, %v2462_v44  ;;  %v1137_v53 = vsel %vm281_vm13, 1.0, %v1261_v17 }
  0xde   :  { %v571_v34 = vmul.f32 %v2486_v54, %v567_v28  ;;  %v573_v22 = vmul.f32 %v2495_v1, %v569_v20  ;;  %v581_v49 = vmul.f32 %v2611_v46, %v575_v4  ;;  %v583_v59 = vmul.f32 %v2611_v46, %v577_v40 }
  0xdf   :  { %v944_v0 = vadd.f32 %v940_v51, %v930_v27  ;;  %v946_v14 = vadd.f32 %v942_v56, %v932_v8  ;;  %v773_v10 = vmul.f32 %v2507_v48, %v2472_v58  ;;  %v775_v3 = vmul.f32 %v771_v52, %v2513_v5 }
  0xe0   :  { %v585_v15 = vmul.f32 %v1135_v7, %v581_v49  ;;  %v779_v44 = vstv %s2598_s0  ;;  %v949_v9 = vmul.f32 %v2523_v60, %v2305_v11  ;;  %v587_v21 = vmul.f32 %v1137_v53, %v583_v59 }
  0xe1   :  { %v1202_v54 = vpack.c.bf16 %v946_v14, %v944_v0  ;;  %v777_v1 = vmul.f32 %v773_v10, %v2518_v45  ;;  %v781_v55 = vmul.f32 %v779_v44, %v575_v4  ;;  %v783_v39 = vmul.f32 %v779_v44, %v577_v40 }
  0xe2   :  { %v589_v57 = vadd.f32 %v585_v15, %v571_v34  ;;  %v951_v41 = vmul.f32 %v2523_v60, %v2309_v29  ;;  %v953_v18 = vmul.f32 %v949_v9, %v2537_v26  ;;  %v591_v58 = vadd.f32 %v587_v21, %v573_v22 }
  0xe3   :  { %1203 = vmatpush1.bf16.msra.mxu0 %v1202_v54  ;;  %v957_v38 = vstv %s2619_s1  ;;  %vm268_vm14 = vcmp.ge.f32.partialorder %v2062_v31, %v2458_v50  ;;  %vm270_vm15 = vcmp.ge.f32.partialorder %v2077_v23, %v2458_v50  ;;  %vm274_vm0 = vcmp.lt.f32.partialorder %v2062_v31, %v273_v13 }
  0xe4   :  { %v785_v11 = vmul.f32 %v781_v55, %v589_v57  ;;  %v955_v5 = vmul.f32 %v951_v41, %v2549_v12  ;;  %v959_v45 = vmul.f32 %v957_v38, %v575_v4  ;;  %v961_v27 = vmul.f32 %v957_v38, %v577_v40  ;;  %vm278_vm2 = vmand %vm268_vm14, %vm274_vm0 }
  0xe5   :  { %v787_v24 = vmul.f32 %v783_v39, %v591_v58  ;;  %vm276_vm1 = vcmp.lt.f32.partialorder %v2077_v23, %v273_v13  ;;  %v562_v29 = vsub.f32 %v2062_v31, %v2301_v43  ;;  %v564_v61 = vsub.f32 %v2077_v23, %v2301_v43 }
  0xe6   :  { %v789_v26 = vadd.f32 %v785_v11, %v775_v3  ;;  %v574_v37 = vsub.f32 %v273_v13, %v2062_v31  ;;  %v576_v32 = vsub.f32 %v273_v13, %v2077_v23  ;;  %vm280_vm3 = vmand %vm270_vm15, %vm276_vm1  ;;  %v1134_v8 = vsel %vm278_vm2, 1.0, %v1261_v17 }
  0xe7   :  { %v791_v12 = vadd.f32 %v787_v24, %v777_v1  ;;  %v566_v42 = vmul.f32 %v562_v29, %v2491_v63  ;;  %v770_v62 = vmul.f32 %v2507_v48, %v2543_v16  ;;  %v1136_v20 = vsel %vm280_vm3, 1.0, %v1261_v17 }
  0xe8   :  { %v963_v28 = vmul.f32 %v959_v45, %v789_v26  ;;  %v568_v43 = vmul.f32 %v564_v61, %v2491_v63  ;;  %v580_v31 = vmul.f32 %v2611_v46, %v574_v37  ;;  %v582_v23 = vmul.f32 %v2611_v46, %v576_v32 }
  0xe9   :  { %v965_v13 = vmul.f32 %v961_v27, %v791_v12  ;;  %v570_v4 = vmul.f32 %v2552_v30, %v566_v42  ;;  %v772_v50 = vmul.f32 %v2507_v48, %v2547_v6  ;;  %v780_v52 = vmul.f32 %v779_v44, %v574_v37  ;;  %v999_v30 = vld [vmem:[%s2703_s3 + $0x8] sm:$0xff] }
  0xea   :  { %v967_v40 = vadd.f32 %v963_v28, %v953_v18  ;;  %v572_v51 = vmul.f32 %v2560_v36, %v568_v43  ;;  %v584_v56 = vmul.f32 %v1134_v8, %v580_v31  ;;  %v586_v7 = vmul.f32 %v1136_v20, %v582_v23 }
  0xeb   :  { %v969_v16 = vadd.f32 %v965_v13, %v955_v5  ;;  %v774_v63 = vmul.f32 %v770_v62, %v2587_v35  ;;  %v782_v53 = vmul.f32 %v779_v44, %v576_v32  ;;  %v948_v34 = vmul.f32 %v2523_v60, %v2390_v47 }
  0xec   :  { %v588_v17 = vadd.f32 %v584_v56, %v570_v4  ;;  %v590_v48 = vadd.f32 %v586_v7, %v572_v51  ;;  %v776_v6 = vmul.f32 %v772_v50, %v2589_v19  ;;  %v950_v36 = vmul.f32 %v2523_v60, %v2396_v33  ;;  %v998_v33 = vld [vmem:[%s2703_s3] sm:$0xff] }
  0xed   :  { %v1204_v46 = vpack.c.bf16 %v969_v16, %v967_v40  ;;  %v958_v49 = vmul.f32 %v957_v38, %v574_v37  ;;  %vm1000_vm4 = vcmask 130048   ;;  %v960_v0 = vmul.f32 %v957_v38, %v576_v32 }
  0xee   :  { %v784_v22 = vmul.f32 %v780_v52, %v588_v17  ;;  %v786_v35 = vmul.f32 %v782_v53, %v590_v48  ;;  %1171 = vmatprep.mubr.msk.f32.mxu0 %vm1000_vm4, %v999_v30  ;;  %v952_v47 = vmul.f32 %v948_v34, %v2613_v25  ;;  %v954_v10 = vmul.f32 %v950_v36, %v2615_v2 }
  0xef   :  { %1205 = vmatprep.subr.bf16.mxu0 %v1204_v46 }
  0xf0   :  { %v788_v14 = vadd.f32 %v784_v22, %v774_v63  ;;  %v790_v59 = vadd.f32 %v786_v35, %v776_v6 }
  0xf2   :  { %v962_v15 = vmul.f32 %v958_v49, %v788_v14  ;;  %v964_v3 = vmul.f32 %v960_v0, %v790_v59 }
  0xf4   :  { %v966_v44 = vadd.f32 %v962_v15, %v952_v47  ;;  %v968_v19 = vadd.f32 %v964_v3, %v954_v10 }
  0xf6   :  { %v1206_v9 = vpack.c.bf16 %v968_v19, %v966_v44 }
  0xf8   :  { %1207 = vmatpush1.bf16.msra.mxu0 %v1206_v9 }
  0xfb   :  { %1069 = vmatmul.mubr.f32.vlgmr.msra.gmra.mrb[0].mxu0 %v998_v33 }
 0x1ce   :  { %v1070_v60 = vpop.f32.mrb[0].mxu0 }
 0x1cf   :  { %1075 = vst [vmem:[%s2704_s4] sm:$0xff] %v1070_v60  ;;  %v1072_v25 = vpop.f32.mrb[1].mxu0 }
 0x1d0   :  { %1076 = vst [vmem:[%s2704_s4 + $0x8] sm:$0xff] %v1072_v25 }
 0x1d1   :  { %1081 = vsyncpa [#allocation3], 1 }
 0x1d2   :  { %1082 = vsyncpa [#allocation5], 1 }

</bundles_post_ra>
